<compile_context>
chip_gen: v7x
topology: tpu7x:2x2x1
jax: 0.10.0
libtpu: 0.0.40
codegen_flags: <defaults>
</compile_context>

<pallas_src>
import numpy as np
import jax
import jax.numpy as jnp
from jax.experimental import pallas as pl
from jax.experimental.pallas import tpu as pltpu

BN_EPS = 1e-5
ACT_DTYPE = jnp.bfloat16   # activation / MXU operand dtype
TILE_M = 512               # row tile for 1x1-conv / matmul kernels
TILE_HW = 512              # per-image spatial tile for the projection kernel

MODEL_TYPES = {
    # (width_coefficient, depth_coefficient, resolution, dropout)
    'b0': (1.0, 1.0, 224, 0.2),
    'b1': (1.0, 1.1, 240, 0.2),
    'b2': (1.1, 1.2, 260, 0.3),
    'b3': (1.2, 1.4, 300, 0.3),
    'b4': (1.4, 1.8, 380, 0.4),
    'b5': (1.6, 2.2, 456, 0.4),
    'b6': (1.8, 2.6, 528, 0.5),
    'b7': (2.0, 3.1, 600, 0.5),
}

# key: (num_layers, in_dim, out_dim, expand_factor, kernel, padding, stride, se_reduction)
MODEL_BLOCKS = {
    'MBConv1':   (1, 32, 16, 1, 3, 1, 1, 4),
    'MBConv6_1': (2, 16, 24, 6, 3, 1, 2, 4),
    'MBConv6_2': (2, 24, 40, 6, 5, 2, 2, 4),
    'MBConv6_3': (3, 40, 80, 6, 3, 1, 2, 4),
    'MBConv6_4': (3, 80, 112, 6, 5, 2, 1, 4),
    'MBConv6_5': (4, 112, 192, 6, 5, 2, 2, 4),
    'MBConv6_6': (1, 192, 320, 6, 3, 1, 1, 4),
}


def _cparams(n_parallel):
    return pltpu.CompilerParams(
        dimension_semantics=("parallel",) * n_parallel)


def _cdiv(a, b):
    return -(-a // b)


# ---------------------------------------------------------------------------
# Fused matmul + BN (+ SiLU) kernel: 1x1 convs, stem im2col, head, classifier.
# Grid tiles the row (M) dimension; weights / scale / bias stay resident.
# ---------------------------------------------------------------------------

def _mm_kernel(act):
    def kernel(x_ref, w_ref, s_ref, b_ref, o_ref):
        y = jnp.dot(x_ref[...], w_ref[...], preferred_element_type=jnp.float32)
        y = y * s_ref[...] + b_ref[...]
        if act == 'silu':
            y = y * jax.nn.sigmoid(y)
        o_ref[...] = y.astype(o_ref.dtype)
    return kernel


def matmul_bn_act(x, w, scale, bias, act='none', out_dtype=ACT_DTYPE,
                  tile_m=TILE_M):
    # x: [M, K] (bf16), w: [K, N] (bf16), scale/bias: [1, N] (f32) -> [M, N]
    M, K = x.shape
    N = w.shape[1]
    tm = int(min(tile_m, M))
    Mp = _cdiv(M, tm) * tm
    if Mp != M:
        x = jnp.pad(x, ((0, Mp - M), (0, 0)))
    flops = 2 * Mp * K * N
    bytes_acc = ((Mp * K + K * N) * x.dtype.itemsize
                 + Mp * N * jnp.dtype(out_dtype).itemsize)
    out = pl.pallas_call(
        _mm_kernel(act),
        out_shape=jax.ShapeDtypeStruct((Mp, N), out_dtype),
        grid=(Mp // tm,),
        in_specs=[
            pl.BlockSpec((tm, K), lambda i: (i, 0)),
            pl.BlockSpec((K, N), lambda i: (0, 0)),
            pl.BlockSpec((1, N), lambda i: (0, 0)),
            pl.BlockSpec((1, N), lambda i: (0, 0)),
        ],
        out_specs=pl.BlockSpec((tm, N), lambda i: (i, 0)),
        compiler_params=_cparams(1),
        cost_estimate=pl.CostEstimate(flops=flops, transcendentals=0,
                                      bytes_accessed=bytes_acc),
    )(x, w, scale, bias)
    return out[:M] if Mp != M else out


# ---------------------------------------------------------------------------
# Depthwise kxk conv + BN + SiLU, with the SE global-average-pool fused into
# the epilogue.  No im2col: the kernel accumulates the k*k taps from stride-1
# slices of (parity-decomposed) padded input.  Grid iterates over the batch.
# ---------------------------------------------------------------------------

def _dw_kernel_factory(k, s, Ho, Wo):
    def kernel(x_ref, w_ref, sc_ref, bi_ref, o_ref, p_ref):
        C = o_ref.shape[-1]
        acc = jnp.zeros((Ho, Wo, C), jnp.float32)
        for dy in range(k):
            for dx in range(k):
                plane = (dy % s) * s + (dx % s)
                ay, ax = dy // s, dx // s
                tap = x_ref[plane, ay:ay + Ho, ax:ax + Wo, :].astype(jnp.float32)
                wt = w_ref[dy * k + dx:dy * k + dx + 1, :].reshape(1, 1, C)
                acc = acc + tap * wt
        y = acc * sc_ref[...].reshape(1, 1, C) + bi_ref[...].reshape(1, 1, C)
        y = y * jax.nn.sigmoid(y)                         # SiLU
        o_ref[...] = y.astype(o_ref.dtype)
        # fused global average pool (for the SE gate)
        pooled = jnp.sum(jnp.sum(y, axis=0), axis=0, keepdims=True)
        p_ref[...] = pooled * (1.0 / float(Ho * Wo))
    return kernel


def depthwise_bn_silu_pool(x, w, scale, bias, k, stride, pad):
    # x: [N, H, W, C] bf16, w: [k*k, C] f32 -> (y: [N,Ho,Wo,C] bf16, pooled: [N,C] f32)
    N, H, W, C = x.shape
    s = stride
    Ho = (H + 2 * pad - k) // s + 1
    Wo = (W + 2 * pad - k) // s + 1
    xp = jnp.pad(x, ((0, 0), (pad, pad), (pad, pad), (0, 0)))
    Hp, Wp = H + 2 * pad, W + 2 * pad
    Hpp, Wpp = _cdiv(Hp, s) * s, _cdiv(Wp, s) * s
    if (Hpp, Wpp) != (Hp, Wp):
        xp = jnp.pad(xp, ((0, 0), (0, Hpp - Hp), (0, Wpp - Wp), (0, 0)))
    if s == 1:
        xs = xp[:, None]                                    # [N, 1, Hp, Wp, C]
    else:
        # space-to-parity: tap (dy,dx) of a stride-s conv becomes a stride-1
        # slice of parity plane (dy%s, dx%s) shifted by (dy//s, dx//s).
        xr = xp.reshape(N, Hpp // s, s, Wpp // s, s, C)
        xs = jnp.transpose(xr, (0, 2, 4, 1, 3, 5)).reshape(
            N, s * s, Hpp // s, Wpp // s, C)
    ss, Hs, Ws = s * s, Hpp // s, Wpp // s

    y, pooled = pl.pallas_call(
        _dw_kernel_factory(k, s, Ho, Wo),
        out_shape=(jax.ShapeDtypeStruct((N, Ho, Wo, C), ACT_DTYPE),
                   jax.ShapeDtypeStruct((N, 1, C), jnp.float32)),
        grid=(N,),
        in_specs=[
            pl.BlockSpec((None, ss, Hs, Ws, C), lambda n: (n, 0, 0, 0, 0)),
            pl.BlockSpec((k * k, C), lambda n: (0, 0)),
            pl.BlockSpec((1, C), lambda n: (0, 0)),
            pl.BlockSpec((1, C), lambda n: (0, 0)),
        ],
        out_specs=(pl.BlockSpec((None, Ho, Wo, C), lambda n: (n, 0, 0, 0)),
                   pl.BlockSpec((None, 1, C), lambda n: (n, 0, 0))),
        compiler_params=_cparams(1),
    )(xs, w, scale, bias)
    return y, pooled.reshape(N, C)


# ---------------------------------------------------------------------------
# Projection: (SE-gate * x) @ W + BN (+ residual).  The [N,1,C] gate is
# broadcast in-kernel (no HBM-sized repeat).  Grid = (batch, spatial tiles).
# ---------------------------------------------------------------------------

def _proj_kernel(has_res):
    def kernel(*refs):
        if has_res:
            x_ref, g_ref, w_ref, s_ref, b_ref, r_ref, o_ref = refs
        else:
            x_ref, g_ref, w_ref, s_ref, b_ref, o_ref = refs
        xs = x_ref[...] * g_ref[...].astype(x_ref.dtype)          # (T, C) bf16
        y = jnp.dot(xs, w_ref[...], preferred_element_type=jnp.float32)
        y = y * s_ref[...] + b_ref[...]
        if has_res:
            y = y + r_ref[...].astype(jnp.float32)
        o_ref[...] = y.astype(o_ref.dtype)
    return kernel


def project_se_bn(x, gate, w, scale, bias, residual=None, tile_hw=TILE_HW):
    # x: [N, HW, C] bf16, gate: [N, 1, C] f32, w: [C, Cout] bf16,
    # residual: optional [N, HW, Cout] bf16 -> [N, HW, Cout] bf16
    N, HW, C = x.shape
    Cout = w.shape[1]
    t = int(min(tile_hw, HW))
    HWp = _cdiv(HW, t) * t
    if HWp != HW:
        x = jnp.pad(x, ((0, 0), (0, HWp - HW), (0, 0)))
        if residual is not None:
            residual = jnp.pad(residual, ((0, 0), (0, HWp - HW), (0, 0)))
    nT = HWp // t
    in_specs = [
        pl.BlockSpec((None, t, C), lambda n, i: (n, i, 0)),
        pl.BlockSpec((None, 1, C), lambda n, i: (n, 0, 0)),
        pl.BlockSpec((C, Cout), lambda n, i: (0, 0)),
        pl.BlockSpec((1, Cout), lambda n, i: (0, 0)),
        pl.BlockSpec((1, Cout), lambda n, i: (0, 0)),
    ]
    args = [x, gate, w, scale, bias]
    if residual is not None:
        in_specs.append(pl.BlockSpec((None, t, Cout), lambda n, i: (n, i, 0)))
        args.append(residual)
    flops = 2 * N * HWp * C * Cout
    bytes_acc = (N * HWp * (2 * C + 2 * Cout) + C * Cout) * 2
    out = pl.pallas_call(
        _proj_kernel(residual is not None),
        out_shape=jax.ShapeDtypeStruct((N, HWp, Cout), ACT_DTYPE),
        grid=(N, nT),
        in_specs=in_specs,
        out_specs=pl.BlockSpec((None, t, Cout), lambda n, i: (n, i, 0)),
        compiler_params=_cparams(2),
        cost_estimate=pl.CostEstimate(flops=flops, transcendentals=0,
                                      bytes_accessed=bytes_acc),
    )(*args)
    return out[:, :HW] if HWp != HW else out


# ---------------------------------------------------------------------------
# Tiny kernels (SE gate MLP, final head pool) -- whole-array blocks are fine.
# ---------------------------------------------------------------------------

def _full_spec(shape):
    nd = len(shape)
    return pl.BlockSpec(shape, lambda i, _nd=nd: (0,) * _nd)


def _se_kernel(p_ref, w1_ref, b1_ref, w2_ref, b2_ref, o_ref):
    h = jnp.dot(p_ref[...], w1_ref[...], preferred_element_type=jnp.float32) + b1_ref[...]
    h = h * jax.nn.sigmoid(h)                              # SiLU
    s = jnp.dot(h, w2_ref[...], preferred_element_type=jnp.float32) + b2_ref[...]
    o_ref[...] = jax.nn.sigmoid(s)


def se_gate(pooled, w1, b1, w2, b2):
    N, C = pooled.shape
    return pl.pallas_call(
        _se_kernel,
        out_shape=jax.ShapeDtypeStruct((N, C), jnp.float32),
        grid=(1,),
        in_specs=[_full_spec(a.shape) for a in (pooled, w1, b1, w2, b2)],
        out_specs=_full_spec((N, C)),
    )(pooled, w1, b1, w2, b2)


def _pool_kernel(x_ref, o_ref):
    o_ref[...] = jnp.mean(x_ref[...].astype(jnp.float32), axis=1)


def global_avg_pool(x):
    # x: [N, HW, C] -> [N, C] (f32)
    N, HW, C = x.shape
    return pl.pallas_call(
        _pool_kernel,
        out_shape=jax.ShapeDtypeStruct((N, C), jnp.float32),
        grid=(1,),
        in_specs=[_full_spec((N, HW, C))],
        out_specs=_full_spec((N, C)),
    )(x)


# ---------------------------------------------------------------------------
# Glue: im2col patch extraction (only used for the 3-channel stem conv, where
# the k^2 blow-up is negligible).
# ---------------------------------------------------------------------------

def extract_patches(x, k, stride, padding):
    N, H, W, C = x.shape
    xp = jnp.pad(x, ((0, 0), (padding, padding), (padding, padding), (0, 0)))
    Hout = (H + 2 * padding - k) // stride + 1
    Wout = (W + 2 * padding - k) // stride + 1
    slabs = []
    for dy in range(k):
        for dx in range(k):
            slabs.append(xp[:, dy:dy + stride * Hout:stride,
                            dx:dx + stride * Wout:stride, :])
    patches = jnp.stack(slabs, axis=3)
    return patches, Hout, Wout


# ---------------------------------------------------------------------------
# Model pieces
# ---------------------------------------------------------------------------

def conv_block(x, p, k, stride, padding):
    # Conv2d + BatchNorm + SiLU
    N, H, W, C = x.shape
    if k == 1 and stride == 1 and padding == 0:
        cols, Ho, Wo = x.reshape(N * H * W, C), H, W
    else:
        patches, Ho, Wo = extract_patches(x, k, stride, padding)
        cols = patches.reshape(N * Ho * Wo, k * k * C)
    y = matmul_bn_act(cols, p['w'], p['scale'], p['bias'], act='silu')
    return y.reshape(N, Ho, Wo, p['w'].shape[1])


def mbconv_layer(x, p):
    N, H, W, Cin = x.shape
    k, stride, pad = p['kernel'], p['stride'], p['padding']
    hidden = p['expand_w'].shape[1]
    Cout = p['proj_w'].shape[1]

    # 1x1 expansion conv + BN + SiLU (applied even when expand factor == 1)
    h = matmul_bn_act(x.reshape(N * H * W, Cin), p['expand_w'],
                      p['expand_scale'], p['expand_bias'], act='silu')
    h = h.reshape(N, H, W, hidden)

    # depthwise kxk conv + BN + SiLU with fused SE average pool
    h, pooled = depthwise_bn_silu_pool(h, p['dw_w'], p['dw_scale'],
                                       p['dw_bias'], k, stride, pad)
    _, Ho, Wo, _ = h.shape

    # squeeze-and-excitation gate (tiny); broadcast happens inside the
    # projection kernel.
    gate = se_gate(pooled, p['se_w1'], p['se_b1'], p['se_w2'], p['se_b2'])

    # 1x1 projection conv + BN (+ residual)
    residual = None
    if stride == 1 and Cin == Cout:
        residual = x.reshape(N, H * W, Cin)
    y = project_se_bn(h.reshape(N, Ho * Wo, hidden),
                      gate.reshape(N, 1, hidden),
                      p['proj_w'], p['proj_scale'], p['proj_bias'], residual)
    return y.reshape(N, Ho, Wo, Cout)


def efficientnet_forward(params, x_nchw):
    x = jnp.transpose(x_nchw, (0, 2, 3, 1)).astype(ACT_DTYPE)   # NCHW -> NHWC
    # stem
    x = conv_block(x, params['stem'], k=3, stride=2, padding=1)
    # MBConv stages
    for layers in params['blocks']:
        for lyr in layers:
            x = mbconv_layer(x, lyr)
    # head 1x1 conv
    x = conv_block(x, params['head'], k=1, stride=1, padding=0)
    # AdaptiveAvgPool2d(1) + flatten
    N, H, W, C = x.shape
    pooled = global_avg_pool(x.reshape(N, H * W, C))            # [N, C] f32
    # classifier (Dropout is identity in eval mode; Linear with bias)
    cls = params['classifier']
    logits = matmul_bn_act(pooled.astype(ACT_DTYPE), cls['w'], cls['scale'],
                           cls['b'], act='none', out_dtype=jnp.float32)
    return logits


# ---------------------------------------------------------------------------
# Deterministic parameter initialization (shapes follow the PyTorch __init__).
# ---------------------------------------------------------------------------

def _bn_fold(c):
    # eval-mode BN with PyTorch defaults, folded into per-channel scale/bias
    scale = jnp.full((c,), 1.0 / float(np.sqrt(1.0 + BN_EPS)), jnp.float32)
    bias = jnp.zeros((c,), jnp.float32)
    return scale, bias


def init_params(key, model_type, image_channels, num_classes):
    width_c, depth_c = MODEL_TYPES[model_type][0], MODEL_TYPES[model_type][1]
    mw = lambda d: int(np.ceil(width_c * d))
    md = lambda n: int(np.ceil(depth_c * n))
    keys = iter(jax.random.split(key, 1024))

    def conv_w(kh, kw, cin, cout, dtype=ACT_DTYPE):
        fan_in = kh * kw * cin
        w = jax.random.normal(next(keys), (kh, kw, cin, cout), jnp.float32)
        w = (w * float(np.sqrt(2.0 / fan_in))).reshape(kh * kw * cin, cout)
        return w.astype(dtype)

    params = {}

    stem_out = mw(32)
    s, b = _bn_fold(stem_out)
    params['stem'] = {'w': conv_w(3, 3, image_channels, stem_out),
                      'scale': s.reshape(1, -1), 'bias': b.reshape(1, -1)}

    blocks = []
    for name in MODEL_BLOCKS:
        nL, din, dout, factor, k, pad, stride, rr = MODEL_BLOCKS[name]
        nL, cin, cout = md(nL), mw(din), mw(dout)
        layers = []
        for i in range(nL):
            lin = cin if i == 0 else cout
            lstride = stride if i == 0 else 1
            hidden = lin * factor
            red = max(1, hidden // rr)
            es, eb = _bn_fold(hidden)
            ds, db = _bn_fold(hidden)
            ps, pb = _bn_fold(cout)
            dw = jax.random.normal(next(keys), (k * k, hidden), jnp.float32)
            layers.append({
                'kernel': k, 'stride': lstride, 'padding': pad,
                'expand_w': conv_w(1, 1, lin, hidden),
                'expand_scale': es.reshape(1, -1), 'expand_bias': eb.reshape(1, -1),
                'dw_w': dw * float(np.sqrt(2.0 / (k * k))),
                'dw_scale': ds.reshape(1, -1), 'dw_bias': db.reshape(1, -1),
                'se_w1': conv_w(1, 1, hidden, red, jnp.float32),
                'se_b1': jnp.zeros((1, red), jnp.float32),
                'se_w2': conv_w(1, 1, red, hidden, jnp.float32),
                'se_b2': jnp.zeros((1, hidden), jnp.float32),
                'proj_w': conv_w(1, 1, hidden, cout),
                'proj_scale': ps.reshape(1, -1), 'proj_bias': pb.reshape(1, -1),
            })
        blocks.append(layers)
    params['blocks'] = blocks

    head_in = mw(MODEL_BLOCKS['MBConv6_6'][2])
    head_out = mw(1280)
    hs, hb = _bn_fold(head_out)
    params['head'] = {'w': conv_w(1, 1, head_in, head_out),
                      'scale': hs.reshape(1, -1), 'bias': hb.reshape(1, -1)}

    lw = jax.random.normal(next(keys), (head_out, num_classes), jnp.float32)
    params['classifier'] = {
        'w': (lw * float(np.sqrt(1.0 / head_out))).astype(ACT_DTYPE),
        'b': jnp.zeros((1, num_classes), jnp.float32),
        'scale': jnp.ones((1, num_classes), jnp.float32),
    }
    return params


if __name__ == "__main__":
    key = jax.random.PRNGKey(0)
    pkey, xkey = jax.random.split(key)

    params = init_params(pkey, 'b0', image_channels=3, num_classes=10)
    # small but large enough to exercise the tiled grids (multi-tile M / HW)
    x = jax.random.normal(xkey, (2, 3, 64, 64), jnp.float32)   # NCHW like PyTorch

    logits = efficientnet_forward(params, x)
    logits = jax.block_until_ready(logits)
    assert logits.shape == (2, 10), logits.shape
    assert bool(jnp.all(jnp.isfinite(logits)))
    print("KERNEL_OK")
</pallas_src>

<mosaic_0001>
module attributes {stable_mosaic.version = 11 : i64} {
  func.func @kernel(%arg0: i32, %arg1: memref<512x27xbf16, #tpu.memory_space<vmem>>, %arg2: memref<27x32xbf16, #tpu.memory_space<vmem>>, %arg3: memref<1x32xf32, #tpu.memory_space<vmem>>, %arg4: memref<1x32xf32, #tpu.memory_space<vmem>>, %arg5: memref<512x32xbf16, #tpu.memory_space<vmem>>) attributes {dimension_semantics = [#tpu.dimension_semantics<parallel>], iteration_bounds = array<i64: 4>, scalar_prefetch = 0 : i64, scratch_operands = 0 : i64, tpu.core_type = #tpu.core_type<tc>, window_params = [{transform_indices = @transform_0, window_bounds = array<i64: 512, 27>}, {pipeline_mode = #tpu.pipeline_mode<synchronous>, transform_indices = @transform_1, window_bounds = array<i64: 27, 32>}, {pipeline_mode = #tpu.pipeline_mode<synchronous>, transform_indices = @transform_2, window_bounds = array<i64: 1, 32>}, {pipeline_mode = #tpu.pipeline_mode<synchronous>, transform_indices = @transform_3, window_bounds = array<i64: 1, 32>}, {transform_indices = @transform_4, window_bounds = array<i64: 512, 32>}]} {
    %c0 = arith.constant 0 : index
    %c0_0 = arith.constant 0 : index
    %0 = vector.load %arg1[%c0, %c0_0] : memref<512x27xbf16, #tpu.memory_space<vmem>>, vector<512x27xbf16>
    %c0_1 = arith.constant 0 : index
    %c0_2 = arith.constant 0 : index
    %1 = vector.load %arg2[%c0_1, %c0_2] : memref<27x32xbf16, #tpu.memory_space<vmem>>, vector<27x32xbf16>
    %cst = arith.constant dense<0.000000e+00> : vector<512x32xf32>
    %2 = tpu.matmul %0, %1, %cst {dimension_numbers = #tpu.dot_dimension_numbers<[1], [0], [0], [1], [0, 0, 1, 1], [], []>} : vector<512x27xbf16>, vector<27x32xbf16>, vector<512x32xf32> -> vector<512x32xf32>
    %c0_3 = arith.constant 0 : index
    %c0_4 = arith.constant 0 : index
    %3 = vector.load %arg3[%c0_3, %c0_4] : memref<1x32xf32, #tpu.memory_space<vmem>>, vector<1x32xf32>
    %4 = vector.broadcast %3 : vector<1x32xf32> to vector<512x32xf32>
    %5 = arith.mulf %2, %4 : vector<512x32xf32>
    %c0_5 = arith.constant 0 : index
    %c0_6 = arith.constant 0 : index
    %6 = vector.load %arg4[%c0_5, %c0_6] : memref<1x32xf32, #tpu.memory_space<vmem>>, vector<1x32xf32>
    %7 = vector.broadcast %6 : vector<1x32xf32> to vector<512x32xf32>
    %8 = arith.addf %5, %7 : vector<512x32xf32>
    %9 = arith.negf %8 : vector<512x32xf32>
    %10 = math.exp %9 : vector<512x32xf32>
    %cst_7 = arith.constant 1.000000e+00 : f32
    %11 = vector.broadcast %cst_7 : f32 to vector<512x32xf32>
    %12 = arith.addf %11, %10 : vector<512x32xf32>
    %13 = arith.divf %11, %12 : vector<512x32xf32>
    %14 = arith.mulf %8, %13 : vector<512x32xf32>
    %15 = arith.truncf %14 : vector<512x32xf32> to vector<512x32xbf16>
    %c0_8 = arith.constant 0 : index
    %c0_9 = arith.constant 0 : index
    %16 = vector.load %arg5[%c0_8, %c0_9] : memref<512x32xbf16, #tpu.memory_space<vmem>>, vector<512x32xbf16>
    tpu.vector_store %arg5[%c0_8, %c0_9], %15 {strides = array<i32>} : memref<512x32xbf16, #tpu.memory_space<vmem>>, vector<512x32xbf16>,
    return
  }
  func.func @transform_0(%arg0: i32) -> (i32, i32) {
    %c0_i32 = arith.constant 0 : i32
    %c0_i32_0 = arith.constant 0 : i32
    return %arg0, %c0_i32 : i32, i32
  }
  func.func @transform_1(%arg0: i32) -> (i32, i32) {
    %c0_i32 = arith.constant 0 : i32
    %c0_i32_0 = arith.constant 0 : i32
    %c0_i32_1 = arith.constant 0 : i32
    return %c0_i32, %c0_i32_0 : i32, i32
  }
  func.func @transform_2(%arg0: i32) -> (i32, i32) {
    %c0_i32 = arith.constant 0 : i32
    %c0_i32_0 = arith.constant 0 : i32
    %c0_i32_1 = arith.constant 0 : i32
    return %c0_i32, %c0_i32_0 : i32, i32
  }
  func.func @transform_3(%arg0: i32) -> (i32, i32) {
    %c0_i32 = arith.constant 0 : i32
    %c0_i32_0 = arith.constant 0 : i32
    %c0_i32_1 = arith.constant 0 : i32
    return %c0_i32, %c0_i32_0 : i32, i32
  }
  func.func @transform_4(%arg0: i32) -> (i32, i32) {
    %c0_i32 = arith.constant 0 : i32
    %c0_i32_0 = arith.constant 0 : i32
    return %arg0, %c0_i32 : i32, i32
  }
}

</mosaic_0001>

<bundles_post_ra>
// kernel: tpu_custom_call.1
= control target key start
LH: loop header
LB: loop body
LE: loop exit
PB: predicated region body
PF: predicated region fallthrough
CT: control target
= control target key end

     0   :  { %s2513_s15 = smov 0   ;;  %s3281_s0 = inlined_call_operand.vmem [shape: bf16[2048,27], index: 0, kind: input, shape index: {}]   ;;  %s3282_s1 = inlined_call_operand.vmem [shape: bf16[27,32], index: 1, kind: input, shape index: {}]   ;;  %s3283_s2 = inlined_call_operand.vmem [shape: f32[1,32], index: 2, kind: input, shape index: {}]   ;;  %s3284_s3 = inlined_call_operand.vmem [shape: f32[1,32], index: 3, kind: input, shape index: {}]   ;;  %s3285_s4 = inlined_call_operand.vmem [shape: bf16[2048,32], index: 4, kind: output, shape index: {}]  }
   0x1 LB: > { %s1801_s16 = sadd.s32 4294967295, %s2485_s15   ;;  %p1805_p0 = scmp.ge.s32.totalorder %s2485_s15, 1  ;;  %s2485_s15 = sphi %s2513_s15, %s14_s15  }
   0x2   : > { %p163_p1 = scmp.lt.s32.totalorder %s2485_s15, 5 }
   0x4   : > { %p164_p2 = pnand %p1805_p0, %p163_p1 }
   0x6   : > { %167 = sbr.rel (%p164_p2) target bundleno = 387 (0x183), region = 36 }
   0xd   : > { %v2187_v0 = vld [vmem:[%s3282_s1] sm:$0xff]   ;;  %vm538_vm0 = vcmask 1044480   ;;  %v2188_v1 = vld [vmem:[%s3282_s1 + $0x8] sm:$0x3f]   ;;  %vm539_vm1 = vcmask 1045504   ;;  %s1806_s21 = sshll.u32 %s1801_s16, 6 }
   0xe   : > { %2106 = vmatprep.subr.bf16.mxu0 %v2187_v0  ;;  %2174 = vmatprep.subr.bf16.mxu1 %v2187_v0  ;;  %v2487_v2 = vmov 65535   ;;  %p190_p3 = scmp.lt.s32.totalorder %s1806_s21, 255  ;;  %vm441_vm2 = vcmask 220160   ;;  %v2604_v38 = vld [vmem:[%s3283_s2] ss:$0 sm:$0xff]  ;;  %vm1680_vm3 = vcmask 257024  }
   0xf   : > { %2107 = vmatpush3.bf16.msra.mxu0 %v2187_v0  ;;  %2176 = vmatpush3.bf16.msra.mxu1 %v2187_v0  ;;  %v540_v3 = vsel %vm538_vm0, 4294967295, %v2487_v2  ;;  %v2609_v40 = vld [vmem:[%s3284_s3] ss:$0 sm:$0xff] }
  0x10   : > { %v541_v4 = vsel %vm539_vm1, %v540_v3, 0  ;;  %s3297_s21 = smov (!%p190_p3, %s1806_s21), 255 }
  0x11   : > { %v543_v5 = vand.u32 %v2188_v1, %v541_v4  ;;  %s1807_s22 = sshll.u32 %s3297_s21, 2 }
  0x12   : > { %s2535_s25 = scalar_lea.vmem %s3281_s0, %s1807_s22  ;;  %s2750_s6 = scalar_lea.vmem %s3285_s4, %s1807_s22 }
  0x13   : > { %2108 = vmatprep.subr.bf16.mxu0 %v543_v5  ;;  %2175 = vmatprep.subr.bf16.mxu1 %v543_v5  ;;  %v2189_v6 = vld [vmem:[%s2535_s25] sm:$0xff]   ;;  %v2191_v8 = vld [vmem:[%s2535_s25 + $0x8] sm:$0xff]   ;;  %v2193_v10 = vld [vmem:[%s2535_s25 + $0x10] sm:$0xff]  }
  0x14   : > { %2109 = vmatpush3.bf16.msra.mxu0 %v543_v5  ;;  %2177 = vmatpush3.bf16.msra.mxu1 %v543_v5  ;;  %v2190_v7 = vld [vmem:[%s2535_s25 + $0x80] sm:$0xff]   ;;  %v2192_v9 = vld [vmem:[%s2535_s25 + $0x88] sm:$0xff]   ;;  %v2194_v11 = vld [vmem:[%s2535_s25 + $0x90] sm:$0xff]  }
  0x15   : > { %2110 = vmatprep.mubr.msk.bf16.mxu0 %vm441_vm2, %v2189_v6  ;;  %2142 = vmatprep.mubr.msk.bf16.mxu1 %vm441_vm2, %v2190_v7  ;;  %v2195_v12 = vld [vmem:[%s2535_s25 + $0x18] sm:$0xff]   ;;  %v2197_v14 = vld [vmem:[%s2535_s25 + $0x20] sm:$0xff]   ;;  %v2199_v16 = vld [vmem:[%s2535_s25 + $0x28] sm:$0xff]  }
  0x16   : > { %v2196_v13 = vld [vmem:[%s2535_s25 + $0x98] sm:$0xff]   ;;  %v2198_v15 = vld [vmem:[%s2535_s25 + $0xa0] sm:$0xff]   ;;  %v2200_v17 = vld [vmem:[%s2535_s25 + $0xa8] sm:$0xff]  }
  0x17   : > { %2111 = vmatmul.mubr.msk.bf16.vlgmr.msra.gmra.mrb[0].mxu0 %vm441_vm2, %v2191_v8  ;;  %2143 = vmatmul.mubr.msk.bf16.vlgmr.msra.gmra.mrb[0].mxu1 %vm441_vm2, %v2192_v9  ;;  %v2201_v18 = vld [vmem:[%s2535_s25 + $0x30] sm:$0xff]   ;;  %v2203_v20 = vld [vmem:[%s2535_s25 + $0x38] sm:$0xff]   ;;  %v2205_v22 = vld [vmem:[%s2535_s25 + $0x40] sm:$0xff]  }
  0x18   : > { %2114 = vmatprep.mubr.msk.bf16.mxu0 %vm441_vm2, %v2193_v10  ;;  %2146 = vmatprep.mubr.msk.bf16.mxu1 %vm441_vm2, %v2194_v11  ;;  %v2202_v19 = vld [vmem:[%s2535_s25 + $0xb0] sm:$0xff]   ;;  %v2204_v21 = vld [vmem:[%s2535_s25 + $0xb8] sm:$0xff]   ;;  %v2206_v23 = vld [vmem:[%s2535_s25 + $0xc0] sm:$0xff]  }
  0x19   : > { %v2207_v24 = vld [vmem:[%s2535_s25 + $0x48] sm:$0xff]   ;;  %v2209_v26 = vld [vmem:[%s2535_s25 + $0x50] sm:$0xff]   ;;  %v2211_v28 = vld [vmem:[%s2535_s25 + $0x58] sm:$0xff]  }
  0x1a   : > { %v2208_v25 = vld [vmem:[%s2535_s25 + $0xc8] sm:$0xff]   ;;  %v2210_v27 = vld [vmem:[%s2535_s25 + $0xd0] sm:$0xff]   ;;  %v2212_v29 = vld [vmem:[%s2535_s25 + $0xd8] sm:$0xff]  }
  0x1b   : > { %v2213_v30 = vld [vmem:[%s2535_s25 + $0x60] sm:$0xff]   ;;  %v2215_v32 = vld [vmem:[%s2535_s25 + $0x68] sm:$0xff]   ;;  %v2217_v34 = vld [vmem:[%s2535_s25 + $0x70] sm:$0xff]  }
  0x1c   : > { %v2214_v31 = vld [vmem:[%s2535_s25 + $0xe0] sm:$0xff]   ;;  %v2216_v33 = vld [vmem:[%s2535_s25 + $0xe8] sm:$0xff]   ;;  %v2218_v35 = vld [vmem:[%s2535_s25 + $0xf0] sm:$0xff]  }
  0x1d   : > { %v2219_v36 = vld [vmem:[%s2535_s25 + $0x78] sm:$0xff]  }
  0x1e   : > { %v2220_v37 = vld [vmem:[%s2535_s25 + $0xf8] sm:$0xff]  }
  0x1f   : > { %2115 = vmatmul.mubr.msk.bf16.gmra.mrb[4].mxu0 %vm441_vm2, %v2195_v12  ;;  %2147 = vmatmul.mubr.msk.bf16.gmra.mrb[4].mxu1 %vm441_vm2, %v2196_v13 }
  0x20   : > { %2118 = vmatprep.mubr.msk.bf16.mxu0 %vm441_vm2, %v2197_v14  ;;  %2150 = vmatprep.mubr.msk.bf16.mxu1 %vm441_vm2, %v2198_v15 }
  0x27   : > { %2119 = vmatmul.mubr.msk.bf16.gmra.mrb[8].mxu0 %vm441_vm2, %v2199_v16  ;;  %2151 = vmatmul.mubr.msk.bf16.gmra.mrb[8].mxu1 %vm441_vm2, %v2200_v17 }
  0x28   : > { %2122 = vmatprep.mubr.msk.bf16.mxu0 %vm441_vm2, %v2201_v18  ;;  %2154 = vmatprep.mubr.msk.bf16.mxu1 %vm441_vm2, %v2202_v19 }
  0x2f   : > { %2123 = vmatmul.mubr.msk.bf16.gmra.mrb[12].mxu0 %vm441_vm2, %v2203_v20  ;;  %2155 = vmatmul.mubr.msk.bf16.gmra.mrb[12].mxu1 %vm441_vm2, %v2204_v21 }
  0x30   : > { %2126 = vmatprep.mubr.msk.bf16.mxu0 %vm441_vm2, %v2205_v22  ;;  %2158 = vmatprep.mubr.msk.bf16.mxu1 %vm441_vm2, %v2206_v23 }
  0x37   : > { %2127 = vmatmul.mubr.msk.bf16.gmra.mrb[16].mxu0 %vm441_vm2, %v2207_v24  ;;  %2159 = vmatmul.mubr.msk.bf16.gmra.mrb[16].mxu1 %vm441_vm2, %v2208_v25 }
  0x38   : > { %2130 = vmatprep.mubr.msk.bf16.mxu0 %vm441_vm2, %v2209_v26  ;;  %2162 = vmatprep.mubr.msk.bf16.mxu1 %vm441_vm2, %v2210_v27 }
  0x3f   : > { %2131 = vmatmul.mubr.msk.bf16.gmra.mrb[20].mxu0 %vm441_vm2, %v2211_v28  ;;  %2163 = vmatmul.mubr.msk.bf16.gmra.mrb[20].mxu1 %vm441_vm2, %v2212_v29 }
  0x40   : > { %2134 = vmatprep.mubr.msk.bf16.mxu0 %vm441_vm2, %v2213_v30  ;;  %2166 = vmatprep.mubr.msk.bf16.mxu1 %vm441_vm2, %v2214_v31 }
  0x47   : > { %2135 = vmatmul.mubr.msk.bf16.gmra.mrb[24].mxu0 %vm441_vm2, %v2215_v32  ;;  %2167 = vmatmul.mubr.msk.bf16.gmra.mrb[24].mxu1 %vm441_vm2, %v2216_v33 }
  0x48   : > { %2138 = vmatprep.mubr.msk.bf16.mxu0 %vm441_vm2, %v2217_v34  ;;  %2170 = vmatprep.mubr.msk.bf16.mxu1 %vm441_vm2, %v2218_v35 }
  0x4f   : > { %2139 = vmatmul.mubr.msk.bf16.gmra.mrb[28].mxu0 %vm441_vm2, %v2219_v36  ;;  %2171 = vmatmul.mubr.msk.bf16.gmra.mrb[28].mxu1 %vm441_vm2, %v2220_v37 }
  0xea   : > { %v2112_v39 = vpop.f32.mrb[0].mxu0  ;;  %v2144_v42 = vpop.f32.mrb[0].mxu1 }
  0xeb   : > { %v843_v41 = vmul.f32 %v2112_v39, %v2604_v38  ;;  %v579_v43 = vpop.f32.mrb[1].mxu0  ;;  %v875_v44 = vmul.f32 %v2144_v42, %v2604_v38  ;;  %v707_v46 = vpop.f32.mrb[1].mxu1 }
  0xec   : > { %v841_v45 = vmul.f32 %v2604_v38, %v579_v43  ;;  %v2113_v47 = vpop.f32.mrb[2].mxu0  ;;  %v873_v49 = vmul.f32 %v2604_v38, %v707_v46  ;;  %v2145_v51 = vpop.f32.mrb[2].mxu1 }
  0xed   : > { %v2615_v48 = vadd.f32 %v2609_v40, %v843_v41  ;;  %v844_v50 = vmul.f32 %v2113_v47, %v2604_v38  ;;  %v582_v52 = vpop.f32.mrb[3].mxu0  ;;  %v2620_v53 = vadd.f32 %v2609_v40, %v875_v44  ;;  %v876_v55 = vmul.f32 %v2145_v51, %v2604_v38  ;;  %v710_v57 = vpop.f32.mrb[3].mxu1 }
  0xee   : > { %v2623_v54 = vadd.f32 %v2609_v40, %v841_v45  ;;  %v842_v56 = vmul.f32 %v2604_v38, %v582_v52  ;;  %v2629_v59 = vadd.f32 %v2609_v40, %v873_v49  ;;  %v874_v61 = vmul.f32 %v2604_v38, %v710_v57 }
  0xef   : > { %v1880_v58 = vmul.f32 -1.442695, %v2615_v48  ;;  %v2632_v60 = vadd.f32 %v2609_v40, %v844_v50  ;;  %v1912_v62 = vmul.f32 -1.442695, %v2620_v53  ;;  %v2638_v0 = vadd.f32 %v2609_v40, %v876_v55 }
  0xf0   : > { %v1878_v63 = vmul.f32 -1.442695, %v2623_v54  ;;  %v2641_v1 = vadd.f32 %v2609_v40, %v842_v56  ;;  %v1910_v2 = vmul.f32 -1.442695, %v2629_v59  ;;  %v2646_v4 = vadd.f32 %v2609_v40, %v874_v61 }
  0xf1   : > { %2221 = vpow2.f32 %v1880_v58  ;;  %v1881_v3 = vmul.f32 -1.442695, %v2632_v60  ;;  %v1913_v5 = vmul.f32 -1.442695, %v2638_v0 }
  0xf2   : > { %2223 = vpow2.f32 %v1912_v62  ;;  %v2116_v6 = vpop.f32.mrb[4].mxu0  ;;  %v1879_v7 = vmul.f32 -1.442695, %v2641_v1  ;;  %v2148_v9 = vpop.f32.mrb[4].mxu1  ;;  %v1911_v11 = vmul.f32 -1.442695, %v2646_v4 }
  0xf3   : > { %2225 = vpow2.f32 %v1878_v63  ;;  %v847_v8 = vmul.f32 %v2116_v6, %v2604_v38  ;;  %v595_v10 = vpop.f32.mrb[5].mxu0  ;;  %v879_v12 = vmul.f32 %v2148_v9, %v2604_v38  ;;  %v723_v14 = vpop.f32.mrb[5].mxu1 }
  0xf4   : > { %2227 = vpow2.f32 %v1910_v2  ;;  %v845_v13 = vmul.f32 %v2604_v38, %v595_v10  ;;  %v2117_v15 = vpop.f32.mrb[6].mxu0  ;;  %v877_v17 = vmul.f32 %v2604_v38, %v723_v14  ;;  %v2149_v19 = vpop.f32.mrb[6].mxu1 }
  0xf5   : > { %2229 = vpow2.f32 %v1881_v3  ;;  %v2655_v16 = vadd.f32 %v2609_v40, %v847_v8  ;;  %v848_v18 = vmul.f32 %v2117_v15, %v2604_v38  ;;  %v598_v20 = vpop.f32.mrb[7].mxu0  ;;  %v2660_v21 = vadd.f32 %v2609_v40, %v879_v12  ;;  %v726_v24 = vpop.f32.mrb[7].mxu1 }
  0xf6   : > { %2231 = vpow2.f32 %v1913_v5  ;;  %v2663_v22 = vadd.f32 %v2609_v40, %v845_v13  ;;  %v880_v23 = vmul.f32 %v2149_v19, %v2604_v38  ;;  %v2668_v26 = vadd.f32 %v2609_v40, %v877_v17 }
  0xf7   : > { %2233 = vpow2.f32 %v1879_v7  ;;  %v1884_v25 = vmul.f32 -1.442695, %v2655_v16  ;;  %v2671_v27 = vadd.f32 %v2609_v40, %v848_v18  ;;  %v1916_v28 = vmul.f32 -1.442695, %v2660_v21 }
  0xf8   : > { %2235 = vpow2.f32 %v1911_v11  ;;  %v1882_v29 = vmul.f32 -1.442695, %v2663_v22  ;;  %v1914_v30 = vmul.f32 -1.442695, %v2668_v26  ;;  %v2678_v32 = vadd.f32 %v2609_v40, %v880_v23 }
  0xf9   : > { %2237 = vpow2.f32 %v1884_v25  ;;  %v1885_v31 = vmul.f32 -1.442695, %v2671_v27  ;;  %v846_v33 = vmul.f32 %v2604_v38, %v598_v20  ;;  %v878_v36 = vmul.f32 %v2604_v38, %v726_v24 }
  0xfa   : > { %2239 = vpow2.f32 %v1916_v28  ;;  %v2120_v34 = vpop.f32.mrb[8].mxu0  ;;  %v2152_v37 = vpop.f32.mrb[8].mxu1  ;;  %v2685_v56 = vmul.f32 -1.442695, %v2678_v32 }
  0xfb   : > { %v2222_v35 = vpop.eup %2221  ;;  %2241 = vpow2.f32 %v1882_v29  ;;  %v611_v39 = vpop.f32.mrb[9].mxu0  ;;  %v851_v43 = vmul.f32 %v2120_v34, %v2604_v38  ;;  %v883_v49 = vmul.f32 %v2152_v37, %v2604_v38  ;;  %v2688_v57 = vadd.f32 %v2609_v40, %v846_v33 }
  0xfc   : > { %v2224_v41 = vpop.eup %2223  ;;  %v1170_v42 = vadd.f32 1.0, %v2222_v35  ;;  %2243 = vpow2.f32 %v1914_v30  ;;  %v739_v44 = vpop.f32.mrb[9].mxu1  ;;  %v2691_v63 = vadd.f32 %v2609_v40, %v878_v36  ;;  %v849_v2 = vmul.f32 %v2604_v38, %v611_v39 }
  0xfd   : > { %v2121_v45 = vpop.f32.mrb[10].mxu0  ;;  %v2226_v46 = vpop.eup %2225  ;;  %v1202_v47 = vadd.f32 1.0, %v2224_v41  ;;  %2245 = vpow2.f32 %v1885_v31  ;;  %v2695_v6 = vadd.f32 %v2609_v40, %v851_v43  ;;  %v881_v7 = vmul.f32 %v2604_v38, %v739_v44 }
  0xfe   : > { %v2153_v50 = vpop.f32.mrb[10].mxu1  ;;  %v614_v51 = vpop.f32.mrb[11].mxu0  ;;  %2247 = vrcp.f32 %v1170_v42  ;;  %v1168_v55 = vadd.f32 1.0, %v2226_v46  ;;  %v2699_v10 = vadd.f32 %v2609_v40, %v883_v49  ;;  %v852_v11 = vmul.f32 %v2121_v45, %v2604_v38 }
  0xff   : > { %v2228_v52 = vpop.eup %2227  ;;  %v742_v58 = vpop.f32.mrb[11].mxu1  ;;  %2249 = vrcp.f32 %v1202_v47  ;;  %v1883_v14 = vmul.f32 -1.442695, %v2688_v57  ;;  %v884_v15 = vmul.f32 %v2153_v50, %v2604_v38  ;;  %v2705_v20 = vmul.f32 -1.442695, %v2691_v63 }
 0x100   : > { %v2230_v61 = vpop.eup %2229  ;;  %v1200_v62 = vadd.f32 1.0, %v2228_v52  ;;  %2251 = vrcp.f32 %v1168_v55  ;;  %v2708_v23 = vadd.f32 %v2609_v40, %v849_v2  ;;  %v2713_v30 = vmul.f32 -1.442695, %v2695_v6 }
 0x101   : > { %v2232_v3 = vpop.eup %2231  ;;  %v1171_v5 = vadd.f32 1.0, %v2230_v61  ;;  %v2716_v31 = vadd.f32 %v2609_v40, %v881_v7  ;;  %v2723_v37 = vmul.f32 -1.442695, %v2699_v10  ;;  %v2726_v39 = vadd.f32 %v2609_v40, %v852_v11 }
 0x102   : > { %v2234_v8 = vpop.eup %2233  ;;  %2253 = vrcp.f32 %v1200_v62  ;;  %v1203_v9 = vadd.f32 1.0, %v2232_v3  ;;  %v2124_v17 = vpop.f32.mrb[12].mxu0  ;;  %v2733_v45 = vadd.f32 %v2609_v40, %v884_v15  ;;  %v850_v46 = vmul.f32 %v2604_v38, %v614_v51 }
 0x103   : > { %v2236_v12 = vpop.eup %2235  ;;  %2255 = vrcp.f32 %v1171_v5  ;;  %v1169_v13 = vadd.f32 1.0, %v2234_v8  ;;  %v2156_v24 = vpop.f32.mrb[12].mxu1  ;;  %v1886_v52 = vmul.f32 -1.442695, %v2708_v23  ;;  %v882_v55 = vmul.f32 %v2604_v38, %v742_v58 }
 0x104   : > { %v2238_v18 = vpop.eup %2237  ;;  %2257 = vrcp.f32 %v1203_v9  ;;  %v1201_v19 = vadd.f32 1.0, %v2236_v12  ;;  %v2710_v25 = vpop.f32.mrb[13].mxu0  ;;  %v1918_v2 = vmul.f32 -1.442695, %v2716_v31  ;;  %v855_v3 = vmul.f32 %v2124_v17, %v2604_v38 }
 0x105   : > { %v2240_v28 = vpop.eup %2239  ;;  %2259 = vrcp.f32 %v1169_v13  ;;  %v1174_v29 = vadd.f32 1.0, %v2238_v18  ;;  %v2718_v33 = vpop.f32.mrb[13].mxu1  ;;  %v1889_v7 = vmul.f32 -1.442695, %v2726_v39  ;;  %v887_v8 = vmul.f32 %v2156_v24, %v2604_v38 }
 0x106   : > { %v2720_v34 = vpop.f32.mrb[14].mxu0  ;;  %v2242_v35 = vpop.eup %2241  ;;  %2261 = vrcp.f32 %v1201_v19  ;;  %v1206_v36 = vadd.f32 1.0, %v2240_v28  ;;  %v1921_v11 = vmul.f32 -1.442695, %v2733_v45  ;;  %v2755_v12 = vadd.f32 %v2609_v40, %v850_v46 }
 0x107   : > { %v2728_v41 = vpop.f32.mrb[14].mxu1  ;;  %v2730_v42 = vpop.f32.mrb[15].mxu0  ;;  %2263 = vrcp.f32 %v1174_v29  ;;  %v1172_v44 = vadd.f32 1.0, %v2242_v35  ;;  %v2762_v18 = vadd.f32 %v2609_v40, %v882_v55  ;;  %v2770_v35 = vadd.f32 %v2609_v40, %v855_v3 }
 0x108   : > { %v2244_v43 = vpop.eup %2243  ;;  %v2736_v47 = vpop.f32.mrb[15].mxu1  ;;  %2265 = vrcp.f32 %v1206_v36  ;;  %v2781_v46 = vadd.f32 %v2609_v40, %v887_v8 }
 0x109   : > { %v2246_v49 = vpop.eup %2245  ;;  %v1204_v50 = vadd.f32 1.0, %v2244_v43  ;;  %2267 = vrcp.f32 %v1172_v44  ;;  %v1892_v8 = vmul.f32 -1.442695, %v2770_v35 }
 0x10a   : > { %v2248_v61 = vpop.eup %2247  ;;  %v1175_v62 = vadd.f32 1.0, %v2246_v49  ;;  %v2764_v19 = vpop.f32.mrb[16].mxu1 }
 0x10b   : > { %v2250_v5 = vpop.eup %2249  ;;  %v1362_v51 = vmul.f32 %v2248_v61, %v2615_v48  ;;  %2269 = vrcp.f32 %v1204_v50  ;;  %v2757_v48 = vpop.f32.mrb[16].mxu0 }
 0x10c   : > { %v2252_v9 = vpop.eup %2251  ;;  %v1394_v58 = vmul.f32 %v2250_v5, %v2620_v53  ;;  %2271 = vrcp.f32 %v1175_v62  ;;  %v2766_v53 = vpop.f32.mrb[17].mxu0  ;;  %v1919_v5 = vmul.f32 -1.442695, %v2762_v18 }
 0x10d   : > { %v2254_v13 = vpop.eup %2253  ;;  %v2010_v15 = vpack.c.bf16 %v1362_v51, %v1362_v51  ;;  %v1360_v17 = vmul.f32 %v2252_v9, %v2623_v54  ;;  %2273 = vpow2.f32 %v2685_v56  ;;  %v2772_v36 = vpop.f32.mrb[17].mxu1 }
 0x10e   : > { %v2256_v24 = vpop.eup %2255  ;;  %v2042_v28 = vpack.c.bf16 %v1394_v58, %v1394_v58  ;;  %v1392_v29 = vmul.f32 %v2254_v13, %v2629_v59  ;;  %2275 = vpow2.f32 %v1883_v14  ;;  %v2774_v54 = vpop.f32.mrb[18].mxu0 }
 0x10f   : > { %v2258_v56 = vpop.eup %2257  ;;  %1683 = vst.msk [vmem:[%s2750_s6 + $0x8] sm:$0xf] %vm1680_vm3, %v2010_v15  ;;  %v2008_v43 = vpack.c.bf16 %v1360_v17, %v1360_v17  ;;  %v1363_v44 = vmul.f32 %v2256_v24, %v2632_v60  ;;  %2277 = vpow2.f32 %v2705_v20  ;;  %v2783_v59 = vpop.f32.mrb[18].mxu1  ;;  %v1887_v60 = vmul.f32 -1.442695, %v2755_v12 }
 0x110   : > { %v2785_v14 = vpop.f32.mrb[19].mxu0  ;;  %v2260_v49 = vpop.eup %2259  ;;  %1715 = vst.msk [vmem:[%s2750_s6 + $0x88] sm:$0xf] %vm1680_vm3, %v2042_v28  ;;  %v2040_v50 = vpack.c.bf16 %v1392_v29, %v1392_v29  ;;  %v1395_v55 = vmul.f32 %v2258_v56, %v2638_v0  ;;  %2279 = vpow2.f32 %v2713_v30  ;;  %v885_v28 = vmul.f32 %v2604_v38, %v2718_v33 }
 0x111   : > { %v2792_v20 = vpop.f32.mrb[19].mxu1  ;;  %v2262_v61 = vpop.eup %2261  ;;  %1681 = vst.msk [vmem:[%s2750_s6] sm:$0xf] %vm1680_vm3, %v2008_v43  ;;  %v2011_v62 = vpack.c.bf16 %v1363_v44, %v1363_v44  ;;  %v1361_v3 = vmul.f32 %v2260_v49, %v2641_v1  ;;  %2281 = vpow2.f32 %v2723_v37  ;;  %v1924_v37 = vmul.f32 -1.442695, %v2781_v46 }
 0x112   : > { %v2264_v51 = vpop.eup %2263  ;;  %1713 = vst.msk [vmem:[%s2750_s6 + $0x80] sm:$0xf] %vm1680_vm3, %v2040_v50  ;;  %v2043_v0 = vpack.c.bf16 %v1395_v55, %v1395_v55  ;;  %v1393_v30 = vmul.f32 %v2262_v61, %v2646_v4  ;;  %2283 = vpow2.f32 %v1886_v52  ;;  %v853_v52 = vmul.f32 %v2604_v38, %v2710_v25  ;;  %v2812_v17 = vpop.f32.mrb[20].mxu0 }
 0x113   : > { %v2266_v9 = vpop.eup %2265  ;;  %1684 = vst.msk [vmem:[%s2750_s6 + $0xc] sm:$0xf] %vm1680_vm3, %v2011_v62  ;;  %v2009_v58 = vpack.c.bf16 %v1361_v3, %v1361_v3  ;;  %v1366_v1 = vmul.f32 %v2264_v51, %v2655_v16  ;;  %2285 = vpow2.f32 %v1918_v2  ;;  %v2819_v29 = vpop.f32.mrb[20].mxu1  ;;  %v856_v43 = vmul.f32 %v2720_v34, %v2604_v38 }
 0x114   : > { %v2268_v13 = vpop.eup %2267  ;;  %1716 = vst.msk [vmem:[%s2750_s6 + $0x8c] sm:$0xf] %vm1680_vm3, %v2043_v0  ;;  %v2041_v15 = vpack.c.bf16 %v1393_v30, %v1393_v30  ;;  %v1398_v4 = vmul.f32 %v2266_v9, %v2660_v21  ;;  %2287 = vpow2.f32 %v1889_v7  ;;  %v2821_v21 = vpop.f32.mrb[21].mxu0  ;;  %v888_v50 = vmul.f32 %v2728_v41, %v2604_v38 }
 0x115   : > { %v2270_v24 = vpop.eup %2269  ;;  %1682 = vst.msk [vmem:[%s2750_s6 + $0x4] sm:$0xf] %vm1680_vm3, %v2009_v58  ;;  %v2014_v16 = vpack.c.bf16 %v1366_v1, %v1366_v1  ;;  %v1364_v2 = vmul.f32 %v2268_v13, %v2663_v22  ;;  %2289 = vpow2.f32 %v1921_v11  ;;  %v2828_v22 = vpop.f32.mrb[21].mxu1  ;;  %v2844_v62 = vadd.f32 %v2609_v40, %v853_v52 }
 0x116   : > { %v2272_v7 = vpop.eup %2271  ;;  %1714 = vst.msk [vmem:[%s2750_s6 + $0x84] sm:$0xf] %vm1680_vm3, %v2041_v15  ;;  %v2046_v25 = vpack.c.bf16 %v1398_v4, %v1398_v4  ;;  %v1396_v56 = vmul.f32 %v2270_v24, %v2668_v26  ;;  %2291 = vpow2.f32 %v1887_v60  ;;  %v2830_v11 = vpop.f32.mrb[22].mxu0  ;;  %v2851_v51 = vadd.f32 %v2609_v40, %v885_v28 }
 0x117   : > { %v2274_v33 = vpop.eup %2273  ;;  %1687 = vst.msk [vmem:[%s2750_s6 + $0x18] sm:$0xf] %vm1680_vm3, %v2014_v16  ;;  %v2012_v44 = vpack.c.bf16 %v1364_v2, %v1364_v2  ;;  %v1367_v49 = vmul.f32 %v2272_v7, %v2671_v27  ;;  %2293 = vpow2.f32 %v1919_v5  ;;  %v2837_v26 = vpop.f32.mrb[22].mxu1  ;;  %v854_v9 = vmul.f32 %v2604_v38, %v2730_v42 }
 0x118   : > { %v2839_v55 = vpop.f32.mrb[23].mxu0  ;;  %v2276_v34 = vpop.eup %2275  ;;  %1719 = vst.msk [vmem:[%s2750_s6 + $0x98] sm:$0xf] %vm1680_vm3, %v2046_v25  ;;  %v2044_v60 = vpack.c.bf16 %v1396_v56, %v1396_v56  ;;  %v1207_v61 = vadd.f32 1.0, %v2274_v33  ;;  %2295 = vpow2.f32 %v1892_v8  ;;  %v2856_v8 = vadd.f32 %v2609_v40, %v856_v43 }
 0x119   : > { %v2846_v27 = vpop.f32.mrb[23].mxu1  ;;  %v2278_v3 = vpop.eup %2277  ;;  %1685 = vst.msk [vmem:[%s2750_s6 + $0x10] sm:$0xf] %vm1680_vm3, %v2012_v44  ;;  %v2015_v41 = vpack.c.bf16 %v1367_v49, %v1367_v49  ;;  %v1173_v5 = vadd.f32 1.0, %v2276_v34  ;;  %2297 = vpow2.f32 %v1924_v37  ;;  %v2863_v37 = vadd.f32 %v2609_v40, %v888_v50 }
 0x11a   : > { %v2280_v0 = vpop.eup %2279  ;;  %1717 = vst.msk [vmem:[%s2750_s6 + $0x90] sm:$0xf] %vm1680_vm3, %v2044_v60  ;;  %2299 = vrcp.f32 %v1207_v61  ;;  %v1205_v30 = vadd.f32 1.0, %v2278_v3  ;;  %v886_v13 = vmul.f32 %v2604_v38, %v2736_v47  ;;  %v2868_v52 = vmul.f32 -1.442695, %v2844_v62  ;;  %v2872_v24 = vpop.f32.mrb[24].mxu0 }
 0x11b   : > { %v2282_v58 = vpop.eup %2281  ;;  %1688 = vst.msk [vmem:[%s2750_s6 + $0x1c] sm:$0xf] %vm1680_vm3, %v2015_v41  ;;  %2301 = vrcp.f32 %v1173_v5  ;;  %v1178_v1 = vadd.f32 1.0, %v2280_v0  ;;  %v859_v42 = vmul.f32 %v2757_v48, %v2604_v38  ;;  %v2875_v28 = vmul.f32 -1.442695, %v2851_v51  ;;  %v2879_v7 = vpop.f32.mrb[24].mxu1 }
 0x11c   : > { %v2284_v15 = vpop.eup %2283  ;;  %2303 = vrcp.f32 %v1205_v30  ;;  %v1210_v4 = vadd.f32 1.0, %v2282_v58  ;;  %v891_v47 = vmul.f32 %v2764_v19, %v2604_v38  ;;  %v2881_v25 = vpop.f32.mrb[25].mxu0  ;;  %v2884_v48 = vmul.f32 -1.442695, %v2856_v8 }
 0x11d   : > { %v2286_v16 = vpop.eup %2285  ;;  %2305 = vrcp.f32 %v1178_v1  ;;  %v1176_v2 = vadd.f32 1.0, %v2284_v15  ;;  %v2887_v33 = vadd.f32 %v2609_v40, %v854_v9  ;;  %v2889_v44 = vpop.f32.mrb[25].mxu1  ;;  %v2894_v34 = vmul.f32 -1.442695, %v2863_v37 }
 0x11e   : > { %v2288_v56 = vpop.eup %2287  ;;  %2307 = vrcp.f32 %v1210_v4  ;;  %v1208_v43 = vadd.f32 1.0, %v2286_v16  ;;  %v2891_v49 = vpop.f32.mrb[26].mxu0  ;;  %v2897_v60 = vadd.f32 %v2609_v40, %v886_v13  ;;  %v2902_v5 = vadd.f32 %v2609_v40, %v859_v42 }
 0x11f   : > { %v2290_v50 = vpop.eup %2289  ;;  %2309 = vrcp.f32 %v1176_v2  ;;  %v1179_v19 = vadd.f32 1.0, %v2288_v56  ;;  %v2899_v61 = vpop.f32.mrb[26].mxu1  ;;  %v857_v0 = vmul.f32 %v2604_v38, %v2766_v53  ;;  %v2911_v13 = vadd.f32 %v2609_v40, %v891_v47 }
 0x120   : > { %v2292_v3 = vpop.eup %2291  ;;  %2311 = vrcp.f32 %v1208_v43  ;;  %v1211_v41 = vadd.f32 1.0, %v2290_v50  ;;  %v2906_v30 = vpop.f32.mrb[27].mxu0  ;;  %v889_v15 = vmul.f32 %v2604_v38, %v2772_v36  ;;  %v1891_v16 = vmul.f32 -1.442695, %v2887_v33 }
 0x121   : > { %v2908_v9 = vpop.f32.mrb[27].mxu1  ;;  %v2294_v58 = vpop.eup %2293  ;;  %2313 = vrcp.f32 %v1179_v19  ;;  %v1177_v1 = vadd.f32 1.0, %v2292_v3  ;;  %v860_v53 = vmul.f32 %v2774_v54, %v2604_v38  ;;  %v1923_v43 = vmul.f32 -1.442695, %v2897_v60 }
 0x122   : > { %3286 = vst [vmem:[#allocation2_spill] sm:$0xff] %v2908_v9  ;;  %v2296_v4 = vpop.eup %2295  ;;  %2315 = vrcp.f32 %v1211_v41  ;;  %v1209_v42 = vadd.f32 1.0, %v2294_v58  ;;  %v2920_v50 = vadd.f32 %v2609_v40, %v857_v0  ;;  %v1896_v36 = vmul.f32 -1.442695, %v2902_v5  ;;  %v2925_v41 = vpop.f32.mrb[28].mxu0 }
 0x123   : > { %v2298_v2 = vpop.eup %2297  ;;  %2317 = vrcp.f32 %v1177_v1  ;;  %v1182_v56 = vadd.f32 1.0, %v2296_v4  ;;  %v892_v3 = vmul.f32 %v2783_v59, %v2604_v38  ;;  %3287 = vst [vmem:[#allocation3_spill] sm:$0xff] %v2925_v41  ;;  %v1928_v1 = vmul.f32 -1.442695, %v2911_v13  ;;  %v2932_v0 = vpop.f32.mrb[28].mxu1 }
 0x124   : > { %v2300_v47 = vpop.eup %2299  ;;  %2319 = vrcp.f32 %v1209_v42  ;;  %v1214_v19 = vadd.f32 1.0, %v2298_v2  ;;  %v2930_v4 = vadd.f32 %v2609_v40, %v889_v15  ;;  %3288 = vst [vmem:[#allocation4_spill] sm:$0xff] %v2932_v0  ;;  %v2934_v42 = vpop.f32.mrb[29].mxu0  ;;  %v2938_v59 = vadd.f32 %v2609_v40, %v860_v53 }
 0x125   : > { %v2302_v58 = vpop.eup %2301  ;;  %v1399_v54 = vmul.f32 %v2300_v47, %v2678_v32  ;;  %2321 = vrcp.f32 %v1182_v56  ;;  %v858_v32 = vmul.f32 %v2604_v38, %v2785_v14  ;;  %v2942_v56 = vpop.f32.mrb[29].mxu1 }
 0x126   : > { %v2304_v2 = vpop.eup %2303  ;;  %v1365_v9 = vmul.f32 %v2302_v58, %v2688_v57  ;;  %2323 = vrcp.f32 %v1214_v19  ;;  %3289 = vst [vmem:[#allocation5_spill] sm:$0xff] %v2942_v56  ;;  %v2944_v47 = vpop.f32.mrb[30].mxu0  ;;  %v1894_v57 = vmul.f32 -1.442695, %v2920_v50 }
 0x127   : > { %v2306_v15 = vpop.eup %2305  ;;  %v2047_v41 = vpack.c.bf16 %v1399_v54, %v1399_v54  ;;  %v1397_v0 = vmul.f32 %v2304_v2, %v2691_v63  ;;  %2325 = vpow2.f32 %v2868_v52  ;;  %v2949_v19 = vpop.f32.mrb[30].mxu1  ;;  %v2956_v54 = vadd.f32 %v2609_v40, %v892_v3 }
 0x128   : > { %3290 = vst [vmem:[#allocation6_spill] sm:$0xff] %v2949_v19  ;;  %v2951_v53 = vpop.f32.mrb[31].mxu0  ;;  %v2308_v58 = vpop.eup %2307  ;;  %v2013_v14 = vpack.c.bf16 %v1365_v9, %v1365_v9  ;;  %v1370_v56 = vmul.f32 %v2306_v15, %v2695_v6  ;;  %2327 = vpow2.f32 %v2875_v28  ;;  %v1926_v9 = vmul.f32 -1.442695, %v2930_v4 }
 0x129   : > { %v2958_v63 = vpop.f32.mrb[31].mxu1  ;;  %v2310_v52 = vpop.eup %2309  ;;  %1720 = vst.msk [vmem:[%s2750_s6 + $0x9c] sm:$0xf] %vm1680_vm3, %v2047_v41  ;;  %v2045_v2 = vpack.c.bf16 %v1397_v0, %v1397_v0  ;;  %v1402_v19 = vmul.f32 %v2308_v58, %v2699_v10  ;;  %2329 = vpow2.f32 %v2884_v48  ;;  %v2970_v15 = vadd.f32 %v2609_v40, %v858_v32 }
 0x12a   : > { %v2312_v6 = vpop.eup %2311  ;;  %1686 = vst.msk [vmem:[%s2750_s6 + $0x14] sm:$0xf] %vm1680_vm3, %v2013_v14  ;;  %v2018_v28 = vpack.c.bf16 %v1370_v56, %v1370_v56  ;;  %v1368_v3 = vmul.f32 %v2310_v52, %v2708_v23  ;;  %2331 = vpow2.f32 %v2894_v34  ;;  %v1897_v0 = vmul.f32 -1.442695, %v2938_v59 }
 0x12b   : > { %v2314_v41 = vpop.eup %2313  ;;  %1718 = vst.msk [vmem:[%s2750_s6 + $0x94] sm:$0xf] %vm1680_vm3, %v2045_v2  ;;  %v2050_v10 = vpack.c.bf16 %v1402_v19, %v1402_v19  ;;  %v1400_v48 = vmul.f32 %v2312_v6, %v2716_v31  ;;  %2333 = vpow2.f32 %v1891_v16  ;;  %v1929_v34 = vmul.f32 -1.442695, %v2956_v54 }
 0x12c   : > { %v2316_v58 = vpop.eup %2315  ;;  %1691 = vst.msk [vmem:[%s2750_s6 + $0x28] sm:$0xf] %vm1680_vm3, %v2018_v28  ;;  %v2016_v23 = vpack.c.bf16 %v1368_v3, %v1368_v3  ;;  %v1371_v56 = vmul.f32 %v2314_v41, %v2726_v39  ;;  %2335 = vpow2.f32 %v1923_v43  ;;  %v890_v16 = vmul.f32 %v2604_v38, %v2792_v20 }
 0x12d   : > { %v2318_v32 = vpop.eup %2317  ;;  %1723 = vst.msk [vmem:[%s2750_s6 + $0xa8] sm:$0xf] %vm1680_vm3, %v2050_v10  ;;  %v2048_v19 = vpack.c.bf16 %v1400_v48, %v1400_v48  ;;  %v1403_v31 = vmul.f32 %v2316_v58, %v2733_v45  ;;  %2337 = vpow2.f32 %v1896_v36  ;;  %v1895_v43 = vmul.f32 -1.442695, %v2970_v15 }
 0x12e   : > { %v2320_v14 = vpop.eup %2319  ;;  %1689 = vst.msk [vmem:[%s2750_s6 + $0x20] sm:$0xf] %vm1680_vm3, %v2016_v23  ;;  %v2019_v52 = vpack.c.bf16 %v1371_v56, %v1371_v56  ;;  %v1369_v39 = vmul.f32 %v2318_v32, %v2755_v12  ;;  %2339 = vpow2.f32 %v1928_v1  ;;  %v863_v20 = vmul.f32 %v2812_v17, %v2604_v38 }
 0x12f   : > { %v2322_v2 = vpop.eup %2321  ;;  %1721 = vst.msk [vmem:[%s2750_s6 + $0xa0] sm:$0xf] %vm1680_vm3, %v2048_v19  ;;  %v2051_v6 = vpack.c.bf16 %v1403_v31, %v1403_v31  ;;  %v1401_v45 = vmul.f32 %v2320_v14, %v2762_v18  ;;  %2341 = vpow2.f32 %v1894_v57  ;;  %v3001_v18 = vadd.f32 %v2609_v40, %v890_v16 }
 0x130   : > { %v2324_v36 = vpop.eup %2323  ;;  %1692 = vst.msk [vmem:[%s2750_s6 + $0x2c] sm:$0xf] %vm1680_vm3, %v2019_v52  ;;  %v2017_v28 = vpack.c.bf16 %v1369_v39, %v1369_v39  ;;  %v1374_v12 = vmul.f32 %v2322_v2, %v2770_v35  ;;  %2343 = vpow2.f32 %v1926_v9  ;;  %v895_v35 = vmul.f32 %v2819_v29, %v2604_v38 }
 0x131   : > { %v2326_v1 = vpop.eup %2325  ;;  %1724 = vst.msk [vmem:[%s2750_s6 + $0xac] sm:$0xf] %vm1680_vm3, %v2051_v6  ;;  %v2049_v3 = vpack.c.bf16 %v1401_v45, %v1401_v45  ;;  %v1406_v41 = vmul.f32 %v2324_v36, %v2781_v46  ;;  %2345 = vpow2.f32 %v1897_v0  ;;  %v3010_v0 = vadd.f32 %v2609_v40, %v863_v20 }
 0x132   : > { %v2328_v17 = vpop.eup %2327  ;;  %1690 = vst.msk [vmem:[%s2750_s6 + $0x24] sm:$0xf] %vm1680_vm3, %v2017_v28  ;;  %v2022_v57 = vpack.c.bf16 %v1374_v12, %v1374_v12  ;;  %v1180_v10 = vadd.f32 1.0, %v2326_v1  ;;  %2347 = vpow2.f32 %v1929_v34  ;;  %v861_v56 = vmul.f32 %v2604_v38, %v2821_v21 }
 0x133   : > { %v2330_v9 = vpop.eup %2329  ;;  %1722 = vst.msk [vmem:[%s2750_s6 + $0xa4] sm:$0xf] %vm1680_vm3, %v2049_v3  ;;  %v2054_v48 = vpack.c.bf16 %v1406_v41, %v1406_v41  ;;  %v1212_v46 = vadd.f32 1.0, %v2328_v17  ;;  %2349 = vpow2.f32 %v1895_v43  ;;  %v893_v32 = vmul.f32 %v2604_v38, %v2828_v22 }
 0x134   : > { %v2332_v58 = vpop.eup %2331  ;;  %1695 = vst.msk [vmem:[%s2750_s6 + $0x38] sm:$0xf] %vm1680_vm3, %v2022_v57  ;;  %2351 = vrcp.f32 %v1180_v10  ;;  %v1183_v23 = vadd.f32 1.0, %v2330_v9  ;;  %v864_v19 = vmul.f32 %v2830_v11, %v2604_v38  ;;  %v1927_v14 = vmul.f32 -1.442695, %v3001_v18 }
 0x135   : > { %v2334_v34 = vpop.eup %2333  ;;  %1727 = vst.msk [vmem:[%s2750_s6 + $0xb8] sm:$0xf] %vm1680_vm3, %v2054_v48  ;;  %2353 = vrcp.f32 %v1212_v46  ;;  %v1215_v29 = vadd.f32 1.0, %v2332_v58  ;;  %v896_v52 = vmul.f32 %v2837_v26, %v2604_v38  ;;  %v1900_v43 = vmul.f32 -1.442695, %v3010_v0 }
 0x136   : > { %v2336_v31 = vpop.eup %2335  ;;  %2355 = vrcp.f32 %v1183_v23  ;;  %v1181_v16 = vadd.f32 1.0, %v2334_v34  ;;  %v3027_v2 = vadd.f32 %v2609_v40, %v895_v35  ;;  %v3030_v11 = vadd.f32 %v2609_v40, %v861_v56 }
 0x137   : > { %v2338_v21 = vpop.eup %2337  ;;  %2357 = vrcp.f32 %v1215_v29  ;;  %v1213_v39 = vadd.f32 1.0, %v2336_v31  ;;  %v862_v45 = vmul.f32 %v2604_v38, %v2839_v55  ;;  %v3035_v36 = vadd.f32 %v2609_v40, %v893_v32 }
 0x138   : > { %v2340_v22 = vpop.eup %2339  ;;  %2359 = vrcp.f32 %v1181_v16  ;;  %v1186_v6 = vadd.f32 1.0, %v2338_v21  ;;  %v3038_v28 = vadd.f32 %v2609_v40, %v864_v19  ;;  %v3041_v3 = vadd.f32 %v2609_v40, %v896_v52 }
 0x139   : > { %v2342_v20 = vpop.eup %2341  ;;  %2361 = vrcp.f32 %v1213_v39  ;;  %v1218_v26 = vadd.f32 1.0, %v2340_v22  ;;  %v894_v41 = vmul.f32 %v2604_v38, %v2846_v27  ;;  %v1932_v57 = vmul.f32 -1.442695, %v3027_v2 }
 0x13a   : > { %v2344_v12 = vpop.eup %2343  ;;  %2363 = vrcp.f32 %v1186_v6  ;;  %v1184_v1 = vadd.f32 1.0, %v2342_v20  ;;  %v3047_v10 = vadd.f32 %v2609_v40, %v862_v45  ;;  %v1898_v48 = vmul.f32 -1.442695, %v3030_v11 }
 0x13b   : > { %v2346_v17 = vpop.eup %2345  ;;  %2365 = vrcp.f32 %v1218_v26  ;;  %v1216_v55 = vadd.f32 1.0, %v2344_v12  ;;  %v867_v46 = vmul.f32 %v2872_v24, %v2604_v38  ;;  %v1930_v27 = vmul.f32 -1.442695, %v3035_v36 }
 0x13c   : > { %v2348_v35 = vpop.eup %2347  ;;  %2367 = vrcp.f32 %v1184_v1  ;;  %v1187_v9 = vadd.f32 1.0, %v2346_v17  ;;  %v1901_v56 = vmul.f32 -1.442695, %v3038_v28  ;;  %v1933_v32 = vmul.f32 -1.442695, %v3041_v3 }
 0x13d   : > { %v2350_v58 = vpop.eup %2349  ;;  %2369 = vrcp.f32 %v1216_v55  ;;  %v1219_v23 = vadd.f32 1.0, %v2348_v35  ;;  %v3056_v19 = vadd.f32 %v2609_v40, %v894_v41  ;;  %v1899_v24 = vmul.f32 -1.442695, %v3047_v10 }
 0x13e   : > { %v2352_v34 = vpop.eup %2351  ;;  %2371 = vrcp.f32 %v1187_v9  ;;  %v1185_v29 = vadd.f32 1.0, %v2350_v58  ;;  %v899_v52 = vmul.f32 %v2879_v7, %v2604_v38  ;;  %v3064_v22 = vadd.f32 %v2609_v40, %v867_v46 }
 0x13f   : > { %v2354_v31 = vpop.eup %2353  ;;  %v1372_v16 = vmul.f32 %v2352_v34, %v2844_v62  ;;  %2373 = vrcp.f32 %v1219_v23  ;;  %v865_v6 = vmul.f32 %v2604_v38, %v2881_v25  ;;  %v897_v7 = vmul.f32 %v2604_v38, %v2889_v44 }
 0x140   : > { %v2356_v21 = vpop.eup %2355  ;;  %v1404_v39 = vmul.f32 %v2354_v31, %v2851_v51  ;;  %2375 = vrcp.f32 %v1185_v29  ;;  %v1931_v1 = vmul.f32 -1.442695, %v3056_v19 }
 0x141   : > { %v2358_v45 = vpop.eup %2357  ;;  %v2020_v20 = vpack.c.bf16 %v1372_v16, %v1372_v16  ;;  %v1375_v62 = vmul.f32 %v2356_v21, %v2856_v8  ;;  %2377 = vpow2.f32 %v1927_v14  ;;  %v3077_v8 = vadd.f32 %v2609_v40, %v899_v52 }
 0x142   : > { %v2360_v26 = vpop.eup %2359  ;;  %v2052_v12 = vpack.c.bf16 %v1404_v39, %v1404_v39  ;;  %v1407_v51 = vmul.f32 %v2358_v45, %v2863_v37  ;;  %2379 = vpow2.f32 %v1900_v43  ;;  %v3083_v14 = vadd.f32 %v2609_v40, %v865_v6 }
 0x143   : > { %v2362_v41 = vpop.eup %2361  ;;  %1693 = vst.msk [vmem:[%s2750_s6 + $0x30] sm:$0xf] %vm1680_vm3, %v2020_v20  ;;  %v2023_v25 = vpack.c.bf16 %v1375_v62, %v1375_v62  ;;  %v1373_v17 = vmul.f32 %v2360_v26, %v2887_v33  ;;  %2381 = vpow2.f32 %v1932_v57  ;;  %v3089_v57 = vadd.f32 %v2609_v40, %v897_v7 }
 0x144   : > { %v2364_v38 = vpop.eup %2363  ;;  %1725 = vst.msk [vmem:[%s2750_s6 + $0xb0] sm:$0xf] %vm1680_vm3, %v2052_v12  ;;  %v2055_v44 = vpack.c.bf16 %v1407_v51, %v1407_v51  ;;  %v1405_v37 = vmul.f32 %v2362_v41, %v2897_v60  ;;  %2383 = vpow2.f32 %v1898_v48  ;;  %v1904_v48 = vmul.f32 -1.442695, %v3064_v22  ;;  %v3291_v51 = vld [vmem:[#allocation2_spill] sm:$0xff] }
 0x145   : > { %v2366_v43 = vpop.eup %2365  ;;  %1696 = vst.msk [vmem:[%s2750_s6 + $0x3c] sm:$0xf] %vm1680_vm3, %v2023_v25  ;;  %v2021_v33 = vpack.c.bf16 %v1373_v17, %v1373_v17  ;;  %v1378_v55 = vmul.f32 %v2364_v38, %v2902_v5  ;;  %2385 = vpow2.f32 %v1930_v27  ;;  %v1936_v40 = vmul.f32 -1.442695, %v3077_v8  ;;  %v3137_v25 = vld [vmem:[%s3284_s3] ss:$0 sm:$0xff] }
 0x146   : > { %v2368_v35 = vpop.eup %2367  ;;  %1728 = vst.msk [vmem:[%s2750_s6 + $0xbc] sm:$0xf] %vm1680_vm3, %v2055_v44  ;;  %v2053_v60 = vpack.c.bf16 %v1405_v37, %v1405_v37  ;;  %v1410_v9 = vmul.f32 %v2366_v43, %v2911_v13  ;;  %2387 = vpow2.f32 %v1901_v56  ;;  %v1902_v56 = vmul.f32 -1.442695, %v3083_v14  ;;  %v3292_v17 = vld [vmem:[#allocation3_spill] sm:$0xff] }
 0x147   : > { %v2370_v46 = vpop.eup %2369  ;;  %1694 = vst.msk [vmem:[%s2750_s6 + $0x34] sm:$0xf] %vm1680_vm3, %v2021_v33  ;;  %v2026_v58 = vpack.c.bf16 %v1378_v55, %v1378_v55  ;;  %v1376_v5 = vmul.f32 %v2368_v35, %v2920_v50  ;;  %2389 = vpow2.f32 %v1933_v32  ;;  %v1934_v32 = vmul.f32 -1.442695, %v3089_v57  ;;  %v3293_v33 = vld [vmem:[#allocation4_spill] sm:$0xff] }
 0x148   : > { %v2372_v23 = vpop.eup %2371  ;;  %1726 = vst.msk [vmem:[%s2750_s6 + $0xb4] sm:$0xf] %vm1680_vm3, %v2053_v60  ;;  %v2058_v27 = vpack.c.bf16 %v1410_v9, %v1410_v9  ;;  %v1408_v13 = vmul.f32 %v2370_v46, %v2930_v4  ;;  %2391 = vpow2.f32 %v1899_v24 }
 0x149   : > { %v2374_v34 = vpop.eup %2373  ;;  %1699 = vst.msk [vmem:[%s2750_s6 + $0x48] sm:$0xf] %vm1680_vm3, %v2026_v58  ;;  %v2024_v29 = vpack.c.bf16 %v1376_v5, %v1376_v5  ;;  %v1379_v50 = vmul.f32 %v2372_v23, %v2938_v59  ;;  %2393 = vpow2.f32 %v1931_v1  ;;  %v3116_v59 = vld [vmem:[%s3283_s2] ss:$0 sm:$0xff] }
 0x14a   : > { %v2376_v31 = vpop.eup %2375  ;;  %1731 = vst.msk [vmem:[%s2750_s6 + $0xc8] sm:$0xf] %vm1680_vm3, %v2058_v27  ;;  %v2056_v16 = vpack.c.bf16 %v1408_v13, %v1408_v13  ;;  %v1411_v52 = vmul.f32 %v2374_v34, %v2956_v54  ;;  %2395 = vpow2.f32 %v1904_v48  ;;  %v868_v39 = vmul.f32 %v3116_v59, %v2891_v49 }
 0x14b   : > { %v2378_v4 = vpop.eup %2377  ;;  %1697 = vst.msk [vmem:[%s2750_s6 + $0x40] sm:$0xf] %vm1680_vm3, %v2024_v29  ;;  %v2027_v24 = vpack.c.bf16 %v1379_v50, %v1379_v50  ;;  %v1377_v21 = vmul.f32 %v2376_v31, %v2970_v15  ;;  %2397 = vpow2.f32 %v1936_v40  ;;  %v900_v15 = vmul.f32 %v3116_v59, %v2899_v61  ;;  %v3294_v40 = vld [vmem:[#allocation5_spill] sm:$0xff] }
 0x14c   : > { %v2380_v6 = vpop.eup %2379  ;;  %1729 = vst.msk [vmem:[%s2750_s6 + $0xc0] sm:$0xf] %vm1680_vm3, %v2056_v16  ;;  %v2059_v54 = vpack.c.bf16 %v1411_v52, %v1411_v52  ;;  %v1217_v45 = vadd.f32 1.0, %v2378_v4  ;;  %2399 = vpow2.f32 %v1902_v56  ;;  %v866_v26 = vmul.f32 %v3116_v59, %v2906_v30 }
 0x14d   : > { %v2382_v20 = vpop.eup %2381  ;;  %1700 = vst.msk [vmem:[%s2750_s6 + $0x4c] sm:$0xf] %vm1680_vm3, %v2027_v24  ;;  %v2025_v62 = vpack.c.bf16 %v1377_v21, %v1377_v21  ;;  %v1190_v7 = vadd.f32 1.0, %v2380_v6  ;;  %2401 = vpow2.f32 %v1934_v32  ;;  %v898_v1 = vmul.f32 %v3116_v59, %v3291_v51 }
 0x14e   : > { %v2384_v49 = vpop.eup %2383  ;;  %1732 = vst.msk [vmem:[%s2750_s6 + $0xcc] sm:$0xf] %vm1680_vm3, %v2059_v54  ;;  %2403 = vrcp.f32 %v1217_v45  ;;  %v1222_v12 = vadd.f32 1.0, %v2382_v20  ;;  %v3140_v30 = vadd.f32 %v3137_v25, %v868_v39  ;;  %v871_v38 = vmul.f32 %v3116_v59, %v3292_v17 }
 0x14f   : > { %v2386_v41 = vpop.eup %2385  ;;  %1698 = vst.msk [vmem:[%s2750_s6 + $0x44] sm:$0xf] %vm1680_vm3, %v2025_v62  ;;  %2405 = vrcp.f32 %v1190_v7  ;;  %v1188_v61 = vadd.f32 1.0, %v2384_v49  ;;  %v3145_v43 = vadd.f32 %v3137_v25, %v900_v15  ;;  %v903_v55 = vmul.f32 %v3116_v59, %v3293_v33  ;;  %v3295_v49 = vld [vmem:[#allocation6_spill] sm:$0xff] }
 0x150   : > { %v2388_v44 = vpop.eup %2387  ;;  %2407 = vrcp.f32 %v1222_v12  ;;  %v1220_v37 = vadd.f32 1.0, %v2386_v41  ;;  %v3150_v9 = vadd.f32 %v3137_v25, %v866_v26  ;;  %v869_v48 = vmul.f32 %v3116_v59, %v2934_v42 }
 0x151   : > { %v2390_v35 = vpop.eup %2389  ;;  %2409 = vrcp.f32 %v1188_v61  ;;  %v1191_v60 = vadd.f32 1.0, %v2388_v44  ;;  %v3155_v5 = vadd.f32 %v3137_v25, %v898_v1  ;;  %v901_v23 = vmul.f32 %v3116_v59, %v3294_v40 }
 0x152   : > { %v2392_v46 = vpop.eup %2391  ;;  %2411 = vrcp.f32 %v1220_v37  ;;  %v1223_v58 = vadd.f32 1.0, %v2390_v35  ;;  %v1905_v56 = vmul.f32 -1.442695, %v3140_v30  ;;  %v3161_v34 = vadd.f32 %v3137_v25, %v871_v38 }
 0x153   : > { %v2394_v27 = vpop.eup %2393  ;;  %2413 = vrcp.f32 %v1191_v60  ;;  %v1189_v13 = vadd.f32 1.0, %v2392_v46  ;;  %v1937_v50 = vmul.f32 -1.442695, %v3145_v43  ;;  %v3165_v32 = vadd.f32 %v3137_v25, %v903_v55 }
 0x154   : > { %v2396_v29 = vpop.eup %2395  ;;  %2415 = vrcp.f32 %v1223_v58  ;;  %v1221_v42 = vadd.f32 1.0, %v2394_v27  ;;  %v1903_v52 = vmul.f32 -1.442695, %v3150_v9  ;;  %v3169_v4 = vadd.f32 %v3137_v25, %v869_v48 }
 0x155   : > { %v2398_v31 = vpop.eup %2397  ;;  %2417 = vrcp.f32 %v1189_v13  ;;  %v1194_v16 = vadd.f32 1.0, %v2396_v29  ;;  %v1935_v39 = vmul.f32 -1.442695, %v3155_v5  ;;  %v3173_v6 = vadd.f32 %v3137_v25, %v901_v23 }
 0x156   : > { %v2400_v24 = vpop.eup %2399  ;;  %2419 = vrcp.f32 %v1221_v42  ;;  %v1226_v21 = vadd.f32 1.0, %v2398_v31  ;;  %v1908_v15 = vmul.f32 -1.442695, %v3161_v34  ;;  %v872_v20 = vmul.f32 %v3116_v59, %v2944_v47 }
 0x157   : > { %v2402_v54 = vpop.eup %2401  ;;  %2421 = vrcp.f32 %v1194_v16  ;;  %v1192_v45 = vadd.f32 1.0, %v2400_v24  ;;  %v1940_v26 = vmul.f32 -1.442695, %v3165_v32  ;;  %v904_v12 = vmul.f32 %v3116_v59, %v3295_v49 }
 0x158   : > { %v2404_v62 = vpop.eup %2403  ;;  %2423 = vrcp.f32 %v1226_v21  ;;  %v1224_v7 = vadd.f32 1.0, %v2402_v54  ;;  %v1906_v41 = vmul.f32 -1.442695, %v3169_v4  ;;  %v870_v61 = vmul.f32 %v3116_v59, %v2951_v53 }
 0x159   : > { %v2406_v51 = vpop.eup %2405  ;;  %v1409_v1 = vmul.f32 %v2404_v62, %v3001_v18  ;;  %2425 = vrcp.f32 %v1192_v45  ;;  %v1938_v38 = vmul.f32 -1.442695, %v3173_v6  ;;  %v902_v44 = vmul.f32 %v3116_v59, %v2958_v63 }
 0x15a   : > { %v2408_v17 = vpop.eup %2407  ;;  %v1382_v47 = vmul.f32 %v2406_v51, %v3010_v0  ;;  %2427 = vrcp.f32 %v1224_v7  ;;  %v3191_v55 = vadd.f32 %v3137_v25, %v872_v20  ;;  %v3195_v0 = vadd.f32 %v3137_v25, %v904_v12 }
 0x15b   : > { %v2410_v37 = vpop.eup %2409  ;;  %v2057_v33 = vpack.c.bf16 %v1409_v1, %v1409_v1  ;;  %v1414_v18 = vmul.f32 %v2408_v17, %v3027_v2  ;;  %2429 = vpow2.f32 %v1905_v56  ;;  %v3201_v2 = vadd.f32 %v3137_v25, %v870_v61 }
 0x15c   : > { %v2412_v53 = vpop.eup %2411  ;;  %v2030_v35 = vpack.c.bf16 %v1382_v47, %v1382_v47  ;;  %v1380_v60 = vmul.f32 %v2410_v37, %v3030_v11  ;;  %2431 = vpow2.f32 %v1937_v50  ;;  %v3207_v40 = vadd.f32 %v3137_v25, %v902_v44 }
 0x15d   : > { %v2414_v48 = vpop.eup %2413  ;;  %1730 = vst.msk [vmem:[%s2750_s6 + $0xc4] sm:$0xf] %vm1680_vm3, %v2057_v33  ;;  %v2062_v63 = vpack.c.bf16 %v1414_v18, %v1414_v18  ;;  %v1412_v59 = vmul.f32 %v2412_v53, %v3035_v36  ;;  %2433 = vpow2.f32 %v1903_v52  ;;  %v1909_v13 = vmul.f32 -1.442695, %v3191_v55 }
 0x15e   : > { %v2416_v46 = vpop.eup %2415  ;;  %1703 = vst.msk [vmem:[%s2750_s6 + $0x58] sm:$0xf] %vm1680_vm3, %v2030_v35  ;;  %v2028_v11 = vpack.c.bf16 %v1380_v60, %v1380_v60  ;;  %v1383_v58 = vmul.f32 %v2414_v48, %v3038_v28  ;;  %2435 = vpow2.f32 %v1935_v39  ;;  %v1941_v25 = vmul.f32 -1.442695, %v3195_v0 }
 0x15f   : > { %v2418_v23 = vpop.eup %2417  ;;  %1735 = vst.msk [vmem:[%s2750_s6 + $0xd8] sm:$0xf] %vm1680_vm3, %v2062_v63  ;;  %v2060_v36 = vpack.c.bf16 %v1412_v59, %v1412_v59  ;;  %v1415_v27 = vmul.f32 %v2416_v46, %v3041_v3  ;;  %2437 = vpow2.f32 %v1908_v15  ;;  %v1907_v31 = vmul.f32 -1.442695, %v3201_v2 }
 0x160   : > { %v2420_v56 = vpop.eup %2419  ;;  %1701 = vst.msk [vmem:[%s2750_s6 + $0x50] sm:$0xf] %vm1680_vm3, %v2028_v11  ;;  %v2031_v29 = vpack.c.bf16 %v1383_v58, %v1383_v58  ;;  %v1381_v28 = vmul.f32 %v2418_v23, %v3047_v10  ;;  %2439 = vpow2.f32 %v1940_v26  ;;  %v1939_v24 = vmul.f32 -1.442695, %v3207_v40 }
 0x161   : > { %v2422_v42 = vpop.eup %2421  ;;  %1733 = vst.msk [vmem:[%s2750_s6 + $0xd0] sm:$0xf] %vm1680_vm3, %v2060_v36  ;;  %v2063_v50 = vpack.c.bf16 %v1415_v27, %v1415_v27  ;;  %v1413_v3 = vmul.f32 %v2420_v56, %v3056_v19  ;;  %2441 = vpow2.f32 %v1906_v41 }
 0x162   : > { %v2424_v16 = vpop.eup %2423  ;;  %1704 = vst.msk [vmem:[%s2750_s6 + $0x5c] sm:$0xf] %vm1680_vm3, %v2031_v29  ;;  %v2029_v52 = vpack.c.bf16 %v1381_v28, %v1381_v28  ;;  %v1386_v10 = vmul.f32 %v2422_v42, %v3064_v22  ;;  %2443 = vpow2.f32 %v1938_v38 }
 0x163   : > { %v2426_v21 = vpop.eup %2425  ;;  %1736 = vst.msk [vmem:[%s2750_s6 + $0xdc] sm:$0xf] %vm1680_vm3, %v2063_v50  ;;  %v2061_v39 = vpack.c.bf16 %v1413_v3, %v1413_v3  ;;  %v1418_v19 = vmul.f32 %v2424_v16, %v3077_v8  ;;  %2445 = vpow2.f32 %v1909_v13 }
 0x164   : > { %v2428_v54 = vpop.eup %2427  ;;  %1702 = vst.msk [vmem:[%s2750_s6 + $0x54] sm:$0xf] %vm1680_vm3, %v2029_v52  ;;  %v2034_v45 = vpack.c.bf16 %v1386_v10, %v1386_v10  ;;  %v1384_v15 = vmul.f32 %v2426_v21, %v3083_v14  ;;  %2447 = vpow2.f32 %v1941_v25 }
 0x165   : > { %v2430_v22 = vpop.eup %2429  ;;  %1734 = vst.msk [vmem:[%s2750_s6 + $0xd4] sm:$0xf] %vm1680_vm3, %v2061_v39  ;;  %v2066_v20 = vpack.c.bf16 %v1418_v19, %v1418_v19  ;;  %v1416_v62 = vmul.f32 %v2428_v54, %v3089_v57  ;;  %2449 = vpow2.f32 %v1907_v31 }
 0x166   : > { %v2432_v7 = vpop.eup %2431  ;;  %1707 = vst.msk [vmem:[%s2750_s6 + $0x68] sm:$0xf] %vm1680_vm3, %v2034_v45  ;;  %v2032_v8 = vpack.c.bf16 %v1384_v15, %v1384_v15  ;;  %v1195_v26 = vadd.f32 1.0, %v2430_v22  ;;  %2451 = vpow2.f32 %v1939_v24 }
 0x167   : > { %v2434_v49 = vpop.eup %2433  ;;  %1739 = vst.msk [vmem:[%s2750_s6 + $0xe8] sm:$0xf] %vm1680_vm3, %v2066_v20  ;;  %v2064_v14 = vpack.c.bf16 %v1416_v62, %v1416_v62  ;;  %v1227_v12 = vadd.f32 1.0, %v2432_v7 }
 0x168   : > { %v2436_v51 = vpop.eup %2435  ;;  %1705 = vst.msk [vmem:[%s2750_s6 + $0x60] sm:$0xf] %vm1680_vm3, %v2032_v8  ;;  %2453 = vrcp.f32 %v1195_v26  ;;  %v1193_v1 = vadd.f32 1.0, %v2434_v49 }
 0x169   : > { %v2438_v41 = vpop.eup %2437  ;;  %1737 = vst.msk [vmem:[%s2750_s6 + $0xe0] sm:$0xf] %vm1680_vm3, %v2064_v14  ;;  %2455 = vrcp.f32 %v1227_v12  ;;  %v1225_v57 = vadd.f32 1.0, %v2436_v51 }
 0x16a   : > { %v2440_v61 = vpop.eup %2439  ;;  %2457 = vrcp.f32 %v1193_v1  ;;  %v1198_v17 = vadd.f32 1.0, %v2438_v41 }
 0x16b   : > { %v2442_v47 = vpop.eup %2441  ;;  %2459 = vrcp.f32 %v1225_v57  ;;  %v1230_v38 = vadd.f32 1.0, %v2440_v61 }
 0x16c   : > { %v2444_v44 = vpop.eup %2443  ;;  %2461 = vrcp.f32 %v1198_v17  ;;  %v1196_v37 = vadd.f32 1.0, %v2442_v47 }
 0x16d   : > { %v2446_v33 = vpop.eup %2445  ;;  %2463 = vrcp.f32 %v1230_v38  ;;  %v1228_v18 = vadd.f32 1.0, %v2444_v44 }
 0x16e   : > { %v2448_v53 = vpop.eup %2447  ;;  %2465 = vrcp.f32 %v1196_v37  ;;  %v1199_v35 = vadd.f32 1.0, %v2446_v33 }
 0x16f   : > { %v2450_v60 = vpop.eup %2449  ;;  %2467 = vrcp.f32 %v1228_v18  ;;  %v1231_v48 = vadd.f32 1.0, %v2448_v53 }
 0x170   : > { %v2452_v63 = vpop.eup %2451  ;;  %2469 = vrcp.f32 %v1199_v35  ;;  %v1197_v59 = vadd.f32 1.0, %v2450_v60 }
 0x171   : > { %2471 = vrcp.f32 %v1231_v48  ;;  %v1229_v46 = vadd.f32 1.0, %v2452_v63 }
 0x172   : > { %v2454_v11 = vpop.eup %2453  ;;  %2473 = vrcp.f32 %v1197_v59 }
 0x173   : > { %v2456_v58 = vpop.eup %2455  ;;  %v1387_v23 = vmul.f32 %v2454_v11, %v3140_v30  ;;  %2475 = vrcp.f32 %v1229_v46 }
 0x174   : > { %v2458_v36 = vpop.eup %2457  ;;  %v1419_v27 = vmul.f32 %v2456_v58, %v3145_v43 }
 0x175   : > { %v2460_v13 = vpop.eup %2459  ;;  %v2035_v56 = vpack.c.bf16 %v1387_v23, %v1387_v23  ;;  %v1385_v29 = vmul.f32 %v2458_v36, %v3150_v9 }
 0x176   : > { %v2462_v28 = vpop.eup %2461  ;;  %v2067_v25 = vpack.c.bf16 %v1419_v27, %v1419_v27  ;;  %v1417_v42 = vmul.f32 %v2460_v13, %v3155_v5 }
 0x177   : > { %v2464_v50 = vpop.eup %2463  ;;  %1708 = vst.msk [vmem:[%s2750_s6 + $0x6c] sm:$0xf] %vm1680_vm3, %v2035_v56  ;;  %v2033_v3 = vpack.c.bf16 %v1385_v29, %v1385_v29  ;;  %v1390_v30 = vmul.f32 %v2462_v28, %v3161_v34 }
 0x178   : > { %v2466_v31 = vpop.eup %2465  ;;  %1740 = vst.msk [vmem:[%s2750_s6 + $0xec] sm:$0xf] %vm1680_vm3, %v2067_v25  ;;  %v2065_v43 = vpack.c.bf16 %v1417_v42, %v1417_v42  ;;  %v1422_v16 = vmul.f32 %v2464_v50, %v3165_v32 }
 0x179   : > { %v2468_v9 = vpop.eup %2467  ;;  %1706 = vst.msk [vmem:[%s2750_s6 + $0x64] sm:$0xf] %vm1680_vm3, %v2033_v3  ;;  %v2038_v52 = vpack.c.bf16 %v1390_v30, %v1390_v30  ;;  %v1388_v5 = vmul.f32 %v2466_v31, %v3169_v4 }
 0x17a   : > { %v2470_v10 = vpop.eup %2469  ;;  %1738 = vst.msk [vmem:[%s2750_s6 + $0xe4] sm:$0xf] %vm1680_vm3, %v2065_v43  ;;  %v2070_v24 = vpack.c.bf16 %v1422_v16, %v1422_v16  ;;  %v1420_v34 = vmul.f32 %v2468_v9, %v3173_v6 }
 0x17b   : > { %v2472_v21 = vpop.eup %2471  ;;  %1711 = vst.msk [vmem:[%s2750_s6 + $0x78] sm:$0xf] %vm1680_vm3, %v2038_v52  ;;  %v2036_v32 = vpack.c.bf16 %v1388_v5, %v1388_v5  ;;  %v1391_v39 = vmul.f32 %v2470_v10, %v3191_v55 }
 0x17c   : > { %v2474_v19 = vpop.eup %2473  ;;  %1743 = vst.msk [vmem:[%s2750_s6 + $0xf8] sm:$0xf] %vm1680_vm3, %v2070_v24  ;;  %v2068_v4 = vpack.c.bf16 %v1420_v34, %v1420_v34  ;;  %v1423_v54 = vmul.f32 %v2472_v21, %v3195_v0 }
 0x17d   : > { %v2476_v45 = vpop.eup %2475  ;;  %1709 = vst.msk [vmem:[%s2750_s6 + $0x70] sm:$0xf] %vm1680_vm3, %v2036_v32  ;;  %v2039_v6 = vpack.c.bf16 %v1391_v39, %v1391_v39  ;;  %v1389_v15 = vmul.f32 %v2474_v19, %v3201_v2 }
 0x17e   : > { %1741 = vst.msk [vmem:[%s2750_s6 + $0xf0] sm:$0xf] %vm1680_vm3, %v2068_v4  ;;  %v2071_v22 = vpack.c.bf16 %v1423_v54, %v1423_v54  ;;  %v1421_v20 = vmul.f32 %v2476_v45, %v3207_v40 }
 0x17f   : > { %1712 = vst.msk [vmem:[%s2750_s6 + $0x7c] sm:$0xf] %vm1680_vm3, %v2039_v6  ;;  %v2037_v55 = vpack.c.bf16 %v1389_v15, %v1389_v15 }
 0x180   : > { %1744 = vst.msk [vmem:[%s2750_s6 + $0xfc] sm:$0xf] %vm1680_vm3, %v2071_v22  ;;  %v2069_v62 = vpack.c.bf16 %v1421_v20, %v1421_v20 }
 0x181   : > { %1710 = vst.msk [vmem:[%s2750_s6 + $0x74] sm:$0xf] %vm1680_vm3, %v2037_v55 }
 0x182   : > { %1742 = vst.msk [vmem:[%s2750_s6 + $0xf4] sm:$0xf] %vm1680_vm3, %v2069_v62 }
 0x183 PF: > { %s14_s15 = sadd.s32 1, %s2485_s15  }
 0x184   : > { %p11_p4 = scmp.ge.s32.totalorder %s14_s15, 6  }
 0x186   :  { %13 = sbr.rel (!%p11_p4) target bundleno = 1 (0x1), region = 66 }

</bundles_post_ra>
